<compile_context>
chip_gen: v7x
topology: tpu7x:2x2x1
jax: 0.10.0
libtpu: 0.0.40
codegen_flags: <defaults>
</compile_context>

<pallas_src>
import functools

import jax
import jax.numpy as jnp
from jax import lax
from jax.experimental import pallas as pl
from jax.experimental.pallas import tpu as pltpu


# --------------------------------------------------------------------------- #
# Fused Pallas kernel: whole UserRatingCritic forward
# --------------------------------------------------------------------------- #
def _critic_fused_kernel(x_ref,
                         emb_w_ref, emb_b_ref,
                         qkv_w_ref, qkv_b_ref,
                         out_w_ref, out_b_ref,
                         fc1_w_ref, fc1_b_ref,
                         fc2_w_ref, fc2_b_ref,
                         fc3_w_ref, fc3_b_ref,
                         o_ref,
                         qkv_scr, attn_scr,
                         *, num_heads, window_size):
    f32 = jnp.float32
    bf16 = jnp.bfloat16
    B = x_ref.shape[0]                 # batch = W * Bp, rows ordered as (w*Bp + b)
    E = emb_w_ref.shape[1]
    W = window_size
    Bp = B // W
    H = num_heads
    hd = E // H

    # ---- embedding: (B, num_items) @ (num_items, E); bf16 MXU operands, f32 acc ----
    emb = jnp.dot(x_ref[...], emb_w_ref[...], preferred_element_type=f32) + emb_b_ref[...]

    # ---- fused QKV in-projection: (B, E) @ (E, 3E); 1/sqrt(hd) already folded into Q ----
    qkv = jnp.dot(emb.astype(bf16), qkv_w_ref[...], preferred_element_type=f32) + qkv_b_ref[...]
    qkv_scr[...] = qkv                 # stash (f32) so window-batch rows can be read strided

    # ---- block-local multi-head attention fused with out_proj ----
    # Window-batch b attends only over its own rows {w*Bp + b : w < W}; no (B,B) scores,
    # no mask.  Bp / H are small & static here, so the loops unroll.
    out_w = out_w_ref[...]             # (E, E) bf16, loaded once
    for b in range(Bp):                # TODO(synk): production -> 'parallel' grid axis
        rows = qkv_scr[pl.ds(b, W, stride=Bp), :]                    # (W, 3E) f32
        acc_b = jnp.zeros((W, E), f32)
        for h in range(H):
            qh = rows[:, h * hd:(h + 1) * hd].astype(bf16)
            kh = rows[:, E + h * hd:E + (h + 1) * hd].astype(bf16)
            vh = rows[:, 2 * E + h * hd:2 * E + (h + 1) * hd].astype(bf16)
            s = lax.dot_general(qh, kh, (((1,), (1,)), ((), ())),
                                preferred_element_type=f32)          # (W, W), f32
            m = jnp.max(s, axis=-1, keepdims=True)                   # softmax kept in f32
            p = jnp.exp(s - m)
            p = p / jnp.sum(p, axis=-1, keepdims=True)
            head = jnp.dot(p.astype(bf16), vh, preferred_element_type=f32)   # (W, hd)
            # fuse the head concat into out_proj: head_h @ out_w[h*hd:(h+1)*hd, :]
            acc_b = acc_b + jnp.dot(head.astype(bf16), out_w[h * hd:(h + 1) * hd, :],
                                    preferred_element_type=f32)
        block = acc_b + out_b_ref[...]                               # (W, E) f32
        # scatter the W rows back to their linear positions (w*Bp + b); static offsets.
        for w in range(W):
            attn_scr[w * Bp + b:w * Bp + b + 1, :] = block[w:w + 1, :]

    # ---- torch .view(W, Bp, E).view(-1, W*E) flatten fused with fc1 ----
    # flat[r, j*E:(j+1)*E] = attn[r*W + j, :]  ==>  chunk j is exactly attn[j::W, :],
    # a stride-W sublane read (no one-hot selection matmul, no O(B^2) input).
    n1 = fc1_w_ref.shape[1]
    acc = jnp.zeros((Bp, n1), f32)
    for j in range(W):
        rows_j = attn_scr[pl.ds(j, Bp, stride=W), :]                 # (Bp, E) f32
        acc = acc + jnp.dot(rows_j.astype(bf16), fc1_w_ref[j * E:(j + 1) * E, :],
                            preferred_element_type=f32)
    h1 = acc + fc1_b_ref[...]
    h1 = jnp.where(h1 >= 0.0, h1, 0.2 * h1)                          # LeakyReLU(0.2), f32

    h2 = jnp.dot(h1.astype(bf16), fc2_w_ref[...], preferred_element_type=f32) + fc2_b_ref[...]
    h2 = jnp.where(h2 >= 0.0, h2, 0.2 * h2)

    # ---- fc3 (out_features = 1): produce a lane-major (1, Bp) row instead of a 1-wide
    # column so the final store is not a width-1 masked store; wrapper reshapes back.
    out = lax.dot_general(fc3_w_ref[...], h2.astype(bf16), (((1,), (1,)), ((), ())),
                          preferred_element_type=f32) + fc3_b_ref[...]       # (1, Bp)
    o_ref[...] = out.astype(o_ref.dtype)


def _full_spec(shape):
    return pl.BlockSpec(shape, lambda i, _n=len(shape): (0,) * _n)


def user_rating_critic(prepared, rating_matrix, *, num_heads, window_size):
    """prepared: dict from prepare_params(). rating_matrix: (B, num_items) float32."""
    B, num_items = rating_matrix.shape
    W = window_size
    Bp = B // W
    p = prepared
    E = p["out_wt"].shape[0]
    n1 = p["fc1_wt"].shape[1]
    n2 = p["fc2_wt"].shape[1]

    # x is the only large activation operand: feed the MXU bf16 (halves its HBM bytes).
    args = (rating_matrix.astype(jnp.bfloat16),
            p["emb_wt"], p["emb_b"], p["qkv_wt"], p["qkv_b"],
            p["out_wt"], p["out_b"], p["fc1_wt"], p["fc1_b"],
            p["fc2_wt"], p["fc2_b"], p["fc3_w"], p["fc3_b"])

    flops = 2 * (B * num_items * E + B * E * 3 * E
                 + Bp * num_heads * 2 * W * W * (E // num_heads)
                 + B * E * E + Bp * W * E * n1 + Bp * n1 * n2 + Bp * n2)
    bytes_accessed = sum(int(a.size) * int(a.dtype.itemsize) for a in args) + Bp * 4
    cost = pl.CostEstimate(flops=int(flops),
                           transcendentals=int(B * num_heads * W),
                           bytes_accessed=int(bytes_accessed))

    kern = functools.partial(_critic_fused_kernel,
                             num_heads=num_heads, window_size=window_size)
    out_row = pl.pallas_call(
        kern,
        grid=(1,),
        out_shape=jax.ShapeDtypeStruct((1, Bp), jnp.float32),
        in_specs=[_full_spec(a.shape) for a in args],
        out_specs=_full_spec((1, Bp)),
        scratch_shapes=[pltpu.VMEM((B, 3 * E), jnp.float32),   # qkv, read strided per window-batch
                        pltpu.VMEM((B, E), jnp.float32)],      # attn out, read strided for the flatten
        compiler_params=pltpu.CompilerParams(
            dimension_semantics=("arbitrary",),
            vmem_limit_bytes=32 * 1024 * 1024),
        cost_estimate=cost,
    )(*args)
    return out_row.reshape(Bp, 1)      # module semantics: (batch // window_size, 1)


# --------------------------------------------------------------------------- #
# Parameters (deterministic, synthetic)
# --------------------------------------------------------------------------- #
def spectral_normalize(w, n_iter=50, eps=1e-12):
    u0 = jnp.ones((w.shape[0],), jnp.float32) / jnp.sqrt(jnp.float32(w.shape[0]))

    def body(_, u):
        v = w.T @ u
        v = v / (jnp.linalg.norm(v) + eps)
        u = w @ v
        u = u / (jnp.linalg.norm(u) + eps)
        return u

    u = lax.fori_loop(0, n_iter, body, u0)
    v = w.T @ u
    v = v / (jnp.linalg.norm(v) + eps)
    sigma = u @ (w @ v)
    return w / sigma


def init_params(key, num_items, embed_dim, num_heads, window_size):
    ks = jax.random.split(key, 12)

    def nrm(k, shape, scale=0.05):
        return (scale * jax.random.normal(k, shape)).astype(jnp.float32)

    p = {}
    # UserAttention.embedding = nn.Linear(num_items, embed_dim)
    p["emb_w"] = nrm(ks[0], (embed_dim, num_items))
    p["emb_b"] = nrm(ks[1], (embed_dim,))
    # nn.MultiheadAttention(embed_dim, num_heads)
    p["in_proj_w"] = nrm(ks[2], (3 * embed_dim, embed_dim))
    p["in_proj_b"] = nrm(ks[3], (3 * embed_dim,))
    p["out_proj_w"] = nrm(ks[4], (embed_dim, embed_dim))
    p["out_proj_b"] = nrm(ks[5], (embed_dim,))
    # fc = SN(Linear(E*W,128)) -> LeakyReLU -> SN(Linear(128,64)) -> LeakyReLU -> SN(Linear(64,1))
    p["fc1_w"] = spectral_normalize(nrm(ks[6], (128, embed_dim * window_size)))
    p["fc1_b"] = nrm(ks[7], (128,))
    p["fc2_w"] = spectral_normalize(nrm(ks[8], (64, 128)))
    p["fc2_b"] = nrm(ks[9], (64,))
    p["fc3_w"] = spectral_normalize(nrm(ks[10], (1, 64)))
    p["fc3_b"] = nrm(ks[11], (1,))
    return p


def prepare_params(params, num_heads):
    """One-time re-layout: transpose every weight to (in_features, out_features), cast
    MXU operands to bf16, fold 1/sqrt(head_dim) into the fused-QKV Q columns, and make
    biases 2-D f32 (all element-wise math stays f32 in-kernel)."""
    f32, bf16 = jnp.float32, jnp.bfloat16
    E = params["out_proj_w"].shape[0]
    scale = 1.0 / float(E // num_heads) ** 0.5

    def t(w):                    # torch (out, in) -> (in, out)
        return jnp.transpose(w).astype(f32)

    def b2(v):
        return v.reshape(1, -1).astype(f32)

    qkv_wt = t(params["in_proj_w"])                      # (E, 3E); columns [0:E] are Q
    qkv_b = b2(params["in_proj_b"])
    qkv_wt = qkv_wt.at[:, :E].multiply(scale)            # fold 1/sqrt(hd), done once on host
    qkv_b = qkv_b.at[:, :E].multiply(scale)

    return {
        "emb_wt": t(params["emb_w"]).astype(bf16),       "emb_b": b2(params["emb_b"]),
        "qkv_wt": qkv_wt.astype(bf16),                   "qkv_b": qkv_b,
        "out_wt": t(params["out_proj_w"]).astype(bf16),  "out_b": b2(params["out_proj_b"]),
        "fc1_wt": t(params["fc1_w"]).astype(bf16),       "fc1_b": b2(params["fc1_b"]),
        "fc2_wt": t(params["fc2_w"]).astype(bf16),       "fc2_b": b2(params["fc2_b"]),
        "fc3_w": params["fc3_w"].astype(bf16),           "fc3_b": b2(params["fc3_b"]),  # (1,64) row
    }


# --------------------------------------------------------------------------- #
# References
# --------------------------------------------------------------------------- #
def reference_f32(params, x, num_heads, window_size):
    """Pure-f32 PyTorch-semantics reference (MultiheadAttention layout + .view flatten)."""
    def lin(t, w, b, slope=None):
        y = t @ w.T + b
        if slope is not None:
            y = jnp.where(y >= 0.0, y, slope * y)
        return y

    B, _ = x.shape
    E = params["emb_w"].shape[0]
    W, H = window_size, num_heads
    Bp, hd = B // W, E // H

    emb = lin(x, params["emb_w"], params["emb_b"])
    wq, wk, wv = jnp.split(params["in_proj_w"], 3, axis=0)
    bq, bk, bv = jnp.split(params["in_proj_b"], 3, axis=0)
    q = lin(emb, wq, bq).reshape(W, Bp * H, hd).transpose(1, 0, 2)
    k = lin(emb, wk, bk).reshape(W, Bp * H, hd).transpose(1, 0, 2)
    v = lin(emb, wv, bv).reshape(W, Bp * H, hd).transpose(1, 0, 2)
    s = jnp.einsum("bqd,bkd->bqk", q, k) / jnp.sqrt(jnp.float32(hd))
    p = jax.nn.softmax(s, axis=-1)
    o = jnp.einsum("bqk,bkd->bqd", p, v).transpose(1, 0, 2).reshape(W * Bp, E)
    attn_out = lin(o, params["out_proj_w"], params["out_proj_b"])
    flat = attn_out.reshape(-1, W * E)
    h1 = lin(flat, params["fc1_w"], params["fc1_b"], 0.2)
    h2 = lin(h1, params["fc2_w"], params["fc2_b"], 0.2)
    return lin(h2, params["fc3_w"], params["fc3_b"])


def reference_prepared(prepared, x, num_heads, window_size):
    """jnp mirror of the kernel's exact math (same bf16 weights / cast points, f32 acc)."""
    f32, bf16 = jnp.float32, jnp.bfloat16
    c = lambda a: a.astype(bf16).astype(f32)
    w = lambda name: prepared[name].astype(f32)

    B = x.shape[0]
    E = prepared["out_wt"].shape[0]
    W, H = window_size, num_heads
    Bp, hd = B // W, E // H

    emb = c(x) @ w("emb_wt") + prepared["emb_b"]
    qkv = c(emb) @ w("qkv_wt") + prepared["qkv_b"]
    attn = jnp.zeros((B, E), f32)
    out_w = w("out_wt")
    for b in range(Bp):
        rows = qkv[b::Bp, :]
        acc_b = jnp.zeros((W, E), f32)
        for h in range(H):
            qh = c(rows[:, h * hd:(h + 1) * hd])
            kh = c(rows[:, E + h * hd:E + (h + 1) * hd])
            vh = c(rows[:, 2 * E + h * hd:2 * E + (h + 1) * hd])
            s = qh @ kh.T
            m = jnp.max(s, axis=-1, keepdims=True)
            p = jnp.exp(s - m)
            p = p / jnp.sum(p, axis=-1, keepdims=True)
            head = c(p) @ vh
            acc_b = acc_b + c(head) @ out_w[h * hd:(h + 1) * hd, :]
        attn = attn.at[b::Bp, :].set(acc_b + prepared["out_b"])
    h1 = jnp.zeros((Bp, prepared["fc1_wt"].shape[1]), f32)
    for j in range(W):
        h1 = h1 + c(attn[j::W, :]) @ w("fc1_wt")[j * E:(j + 1) * E, :]
    h1 = h1 + prepared["fc1_b"]
    h1 = jnp.where(h1 >= 0.0, h1, 0.2 * h1)
    h2 = c(h1) @ w("fc2_wt") + prepared["fc2_b"]
    h2 = jnp.where(h2 >= 0.0, h2, 0.2 * h2)
    return c(h2) @ w("fc3_w").T + prepared["fc3_b"]      # (Bp, 1)


# --------------------------------------------------------------------------- #
if __name__ == "__main__":
    num_items = 32
    embed_dim = 32
    num_heads = 4
    window_size = 4
    batch_size = 8          # must be divisible by window_size -> batch' = 2

    rating_matrix = jax.random.uniform(jax.random.PRNGKey(0),
                                       (batch_size, num_items), dtype=jnp.float32)

    params = init_params(jax.random.PRNGKey(42), num_items, embed_dim,
                         num_heads, window_size)
    prepared = prepare_params(params, num_heads)   # bf16 weights, scale folded -- done ONCE

    fwd = jax.jit(functools.partial(user_rating_critic,
                                    num_heads=num_heads, window_size=window_size))
    out = jax.block_until_ready(fwd(prepared, rating_matrix))
    assert out.shape == (batch_size // window_size, 1)

    # Tight check vs. a jnp mirror using the same bf16 weights / cast points
    # (isolates kernel bugs from bf16 quantization).
    ref_bf16 = reference_prepared(prepared, rating_matrix, num_heads, window_size)
    assert jnp.allclose(out, ref_bf16, atol=1e-3, rtol=1e-3), (out, ref_bf16)

    # Loose check vs. the pure-f32 PyTorch-semantics reference (bounds total bf16 error).
    ref_f32 = reference_f32(params, rating_matrix, num_heads, window_size)
    assert jnp.allclose(out, ref_f32, atol=2e-2, rtol=2e-2), (out, ref_f32)

    print("KERNEL_OK")
</pallas_src>

<mosaic_0001>
module attributes {stable_mosaic.version = 11 : i64} {
  func.func @_critic_fused_kernel(%arg0: i32, %arg1: memref<8x32xbf16, #tpu.memory_space<vmem>>, %arg2: memref<32x32xbf16, #tpu.memory_space<vmem>>, %arg3: memref<1x32xf32, #tpu.memory_space<vmem>>, %arg4: memref<32x96xbf16, #tpu.memory_space<vmem>>, %arg5: memref<1x96xf32, #tpu.memory_space<vmem>>, %arg6: memref<32x32xbf16, #tpu.memory_space<vmem>>, %arg7: memref<1x32xf32, #tpu.memory_space<vmem>>, %arg8: memref<128x128xbf16, #tpu.memory_space<vmem>>, %arg9: memref<1x128xf32, #tpu.memory_space<vmem>>, %arg10: memref<128x64xbf16, #tpu.memory_space<vmem>>, %arg11: memref<1x64xf32, #tpu.memory_space<vmem>>, %arg12: memref<1x64xbf16, #tpu.memory_space<vmem>>, %arg13: memref<1x1xf32, #tpu.memory_space<vmem>>, %arg14: memref<1x2xf32, #tpu.memory_space<vmem>>, %arg15: memref<8x96xf32, #tpu.memory_space<vmem>>, %arg16: memref<8x32xf32, #tpu.memory_space<vmem>>) attributes {dimension_semantics = [#tpu.dimension_semantics<arbitrary>], iteration_bounds = array<i64: 1>, scalar_prefetch = 0 : i64, scratch_operands = 2 : i64, tpu.core_type = #tpu.core_type<tc>, window_params = [{pipeline_mode = #tpu.pipeline_mode<synchronous>, transform_indices = @transform_0, window_bounds = array<i64: 8, 32>}, {pipeline_mode = #tpu.pipeline_mode<synchronous>, transform_indices = @transform_1, window_bounds = array<i64: 32, 32>}, {pipeline_mode = #tpu.pipeline_mode<synchronous>, transform_indices = @transform_2, window_bounds = array<i64: 1, 32>}, {pipeline_mode = #tpu.pipeline_mode<synchronous>, transform_indices = @transform_3, window_bounds = array<i64: 32, 96>}, {pipeline_mode = #tpu.pipeline_mode<synchronous>, transform_indices = @transform_4, window_bounds = array<i64: 1, 96>}, {pipeline_mode = #tpu.pipeline_mode<synchronous>, transform_indices = @transform_5, window_bounds = array<i64: 32, 32>}, {pipeline_mode = #tpu.pipeline_mode<synchronous>, transform_indices = @transform_6, window_bounds = array<i64: 1, 32>}, {pipeline_mode = #tpu.pipeline_mode<synchronous>, transform_indices = @transform_7, window_bounds = array<i64: 128, 128>}, {pipeline_mode = #tpu.pipeline_mode<synchronous>, transform_indices = @transform_8, window_bounds = array<i64: 1, 128>}, {pipeline_mode = #tpu.pipeline_mode<synchronous>, transform_indices = @transform_9, window_bounds = array<i64: 128, 64>}, {pipeline_mode = #tpu.pipeline_mode<synchronous>, transform_indices = @transform_10, window_bounds = array<i64: 1, 64>}, {pipeline_mode = #tpu.pipeline_mode<synchronous>, transform_indices = @transform_11, window_bounds = array<i64: 1, 64>}, {pipeline_mode = #tpu.pipeline_mode<synchronous>, transform_indices = @transform_12, window_bounds = array<i64: 1, 1>}, {pipeline_mode = #tpu.pipeline_mode<synchronous>, transform_indices = @transform_13, window_bounds = array<i64: 1, 2>}]} {
    %c0 = arith.constant 0 : index
    %c0_0 = arith.constant 0 : index
    %0 = vector.load %arg1[%c0, %c0_0] : memref<8x32xbf16, #tpu.memory_space<vmem>>, vector<8x32xbf16>
    %c0_1 = arith.constant 0 : index
    %c0_2 = arith.constant 0 : index
    %1 = vector.load %arg2[%c0_1, %c0_2] : memref<32x32xbf16, #tpu.memory_space<vmem>>, vector<32x32xbf16>
    %cst = arith.constant dense<0.000000e+00> : vector<8x32xf32>
    %2 = tpu.matmul %0, %1, %cst {dimension_numbers = #tpu.dot_dimension_numbers<[1], [0], [0], [1], [0, 0, 1, 1], [], []>} : vector<8x32xbf16>, vector<32x32xbf16>, vector<8x32xf32> -> vector<8x32xf32>
    %c0_3 = arith.constant 0 : index
    %c0_4 = arith.constant 0 : index
    %3 = vector.load %arg3[%c0_3, %c0_4] : memref<1x32xf32, #tpu.memory_space<vmem>>, vector<1x32xf32>
    %4 = vector.broadcast %3 : vector<1x32xf32> to vector<8x32xf32>
    %5 = arith.addf %2, %4 : vector<8x32xf32>
    %6 = arith.truncf %5 : vector<8x32xf32> to vector<8x32xbf16>
    %c0_5 = arith.constant 0 : index
    %c0_6 = arith.constant 0 : index
    %7 = vector.load %arg4[%c0_5, %c0_6] : memref<32x96xbf16, #tpu.memory_space<vmem>>, vector<32x96xbf16>
    %cst_7 = arith.constant dense<0.000000e+00> : vector<8x96xf32>
    %8 = tpu.matmul %6, %7, %cst_7 {dimension_numbers = #tpu.dot_dimension_numbers<[1], [0], [0], [1], [0, 0, 1, 1], [], []>} : vector<8x32xbf16>, vector<32x96xbf16>, vector<8x96xf32> -> vector<8x96xf32>
    %c0_8 = arith.constant 0 : index
    %c0_9 = arith.constant 0 : index
    %9 = vector.load %arg5[%c0_8, %c0_9] : memref<1x96xf32, #tpu.memory_space<vmem>>, vector<1x96xf32>
    %10 = vector.broadcast %9 : vector<1x96xf32> to vector<8x96xf32>
    %11 = arith.addf %8, %10 : vector<8x96xf32>
    %c0_10 = arith.constant 0 : index
    %c0_11 = arith.constant 0 : index
    %12 = vector.load %arg15[%c0_10, %c0_11] : memref<8x96xf32, #tpu.memory_space<vmem>>, vector<8x96xf32>
    tpu.vector_store %arg15[%c0_10, %c0_11], %11 {strides = array<i32>} : memref<8x96xf32, #tpu.memory_space<vmem>>, vector<8x96xf32>,
    %c0_12 = arith.constant 0 : index
    %c0_13 = arith.constant 0 : index
    %13 = vector.load %arg6[%c0_12, %c0_13] : memref<32x32xbf16, #tpu.memory_space<vmem>>, vector<32x32xbf16>
    %c0_14 = arith.constant 0 : index
    %c0_15 = arith.constant 0 : index
    %14 = tpu.strided_load %arg15[%c0_14, %c0_15] {strides = array<i32: 2, 1>} : memref<8x96xf32, #tpu.memory_space<vmem>>, vector<4x96xf32>
    %cst_16 = arith.constant 0.000000e+00 : f32
    %15 = vector.broadcast %cst_16 : f32 to vector<4x32xf32>
    %16 = vector.extract_strided_slice %14 {offsets = [0, 0], sizes = [4, 8], strides = [1, 1]} : vector<4x96xf32> to vector<4x8xf32>
    %17 = arith.truncf %16 : vector<4x8xf32> to vector<4x8xbf16>
    %18 = vector.extract_strided_slice %14 {offsets = [0, 32], sizes = [4, 8], strides = [1, 1]} : vector<4x96xf32> to vector<4x8xf32>
    %19 = arith.truncf %18 : vector<4x8xf32> to vector<4x8xbf16>
    %20 = vector.extract_strided_slice %14 {offsets = [0, 64], sizes = [4, 8], strides = [1, 1]} : vector<4x96xf32> to vector<4x8xf32>
    %21 = arith.truncf %20 : vector<4x8xf32> to vector<4x8xbf16>
    %cst_17 = arith.constant dense<0.000000e+00> : vector<4x4xf32>
    %22 = tpu.matmul %17, %19, %cst_17 {dimension_numbers = #tpu.dot_dimension_numbers<[1], [1], [0], [0], [0, 0, 1, 0], [], []>} : vector<4x8xbf16>, vector<4x8xbf16>, vector<4x4xf32> -> vector<4x4xf32>
    %cst_18 = arith.constant dense<0xFF800000> : vector<4xf32>
    %23 = vector.multi_reduction <maximumf>, %22, %cst_18 [1] : vector<4x4xf32> to vector<4xf32>
    %24 = vector.shape_cast %23 : vector<4xf32> to vector<4x1xf32>
    %25 = vector.broadcast %24 : vector<4x1xf32> to vector<4x4xf32>
    %26 = arith.subf %22, %25 : vector<4x4xf32>
    %27 = math.exp %26 : vector<4x4xf32>
    %cst_19 = arith.constant dense<0.000000e+00> : vector<4xf32>
    %28 = vector.multi_reduction <add>, %27, %cst_19 [1] : vector<4x4xf32> to vector<4xf32>
    %29 = vector.shape_cast %28 : vector<4xf32> to vector<4x1xf32>
    %30 = vector.broadcast %29 : vector<4x1xf32> to vector<4x4xf32>
    %31 = arith.divf %27, %30 : vector<4x4xf32>
    %32 = arith.truncf %31 : vector<4x4xf32> to vector<4x4xbf16>
    %cst_20 = arith.constant dense<0.000000e+00> : vector<4x8xf32>
    %33 = tpu.matmul %32, %21, %cst_20 {dimension_numbers = #tpu.dot_dimension_numbers<[1], [0], [0], [1], [0, 0, 1, 1], [], []>} : vector<4x4xbf16>, vector<4x8xbf16>, vector<4x8xf32> -> vector<4x8xf32>
    %34 = arith.truncf %33 : vector<4x8xf32> to vector<4x8xbf16>
    %35 = vector.extract_strided_slice %13 {offsets = [0, 0], sizes = [8, 32], strides = [1, 1]} : vector<32x32xbf16> to vector<8x32xbf16>
    %cst_21 = arith.constant dense<0.000000e+00> : vector<4x32xf32>
    %36 = tpu.matmul %34, %35, %cst_21 {dimension_numbers = #tpu.dot_dimension_numbers<[1], [0], [0], [1], [0, 0, 1, 1], [], []>} : vector<4x8xbf16>, vector<8x32xbf16>, vector<4x32xf32> -> vector<4x32xf32>
    %37 = arith.addf %15, %36 : vector<4x32xf32>
    %38 = vector.extract_strided_slice %14 {offsets = [0, 8], sizes = [4, 8], strides = [1, 1]} : vector<4x96xf32> to vector<4x8xf32>
    %39 = arith.truncf %38 : vector<4x8xf32> to vector<4x8xbf16>
    %40 = vector.extract_strided_slice %14 {offsets = [0, 40], sizes = [4, 8], strides = [1, 1]} : vector<4x96xf32> to vector<4x8xf32>
    %41 = arith.truncf %40 : vector<4x8xf32> to vector<4x8xbf16>
    %42 = vector.extract_strided_slice %14 {offsets = [0, 72], sizes = [4, 8], strides = [1, 1]} : vector<4x96xf32> to vector<4x8xf32>
    %43 = arith.truncf %42 : vector<4x8xf32> to vector<4x8xbf16>
    %cst_22 = arith.constant dense<0.000000e+00> : vector<4x4xf32>
    %44 = tpu.matmul %39, %41, %cst_22 {dimension_numbers = #tpu.dot_dimension_numbers<[1], [1], [0], [0], [0, 0, 1, 0], [], []>} : vector<4x8xbf16>, vector<4x8xbf16>, vector<4x4xf32> -> vector<4x4xf32>
    %cst_23 = arith.constant dense<0xFF800000> : vector<4xf32>
    %45 = vector.multi_reduction <maximumf>, %44, %cst_23 [1] : vector<4x4xf32> to vector<4xf32>
    %46 = vector.shape_cast %45 : vector<4xf32> to vector<4x1xf32>
    %47 = vector.broadcast %46 : vector<4x1xf32> to vector<4x4xf32>
    %48 = arith.subf %44, %47 : vector<4x4xf32>
    %49 = math.exp %48 : vector<4x4xf32>
    %cst_24 = arith.constant dense<0.000000e+00> : vector<4xf32>
    %50 = vector.multi_reduction <add>, %49, %cst_24 [1] : vector<4x4xf32> to vector<4xf32>
    %51 = vector.shape_cast %50 : vector<4xf32> to vector<4x1xf32>
    %52 = vector.broadcast %51 : vector<4x1xf32> to vector<4x4xf32>
    %53 = arith.divf %49, %52 : vector<4x4xf32>
    %54 = arith.truncf %53 : vector<4x4xf32> to vector<4x4xbf16>
    %cst_25 = arith.constant dense<0.000000e+00> : vector<4x8xf32>
    %55 = tpu.matmul %54, %43, %cst_25 {dimension_numbers = #tpu.dot_dimension_numbers<[1], [0], [0], [1], [0, 0, 1, 1], [], []>} : vector<4x4xbf16>, vector<4x8xbf16>, vector<4x8xf32> -> vector<4x8xf32>
    %56 = arith.truncf %55 : vector<4x8xf32> to vector<4x8xbf16>
    %57 = vector.extract_strided_slice %13 {offsets = [8, 0], sizes = [8, 32], strides = [1, 1]} : vector<32x32xbf16> to vector<8x32xbf16>
    %cst_26 = arith.constant dense<0.000000e+00> : vector<4x32xf32>
    %58 = tpu.matmul %56, %57, %cst_26 {dimension_numbers = #tpu.dot_dimension_numbers<[1], [0], [0], [1], [0, 0, 1, 1], [], []>} : vector<4x8xbf16>, vector<8x32xbf16>, vector<4x32xf32> -> vector<4x32xf32>
    %59 = arith.addf %37, %58 : vector<4x32xf32>
    %60 = vector.extract_strided_slice %14 {offsets = [0, 16], sizes = [4, 8], strides = [1, 1]} : vector<4x96xf32> to vector<4x8xf32>
    %61 = arith.truncf %60 : vector<4x8xf32> to vector<4x8xbf16>
    %62 = vector.extract_strided_slice %14 {offsets = [0, 48], sizes = [4, 8], strides = [1, 1]} : vector<4x96xf32> to vector<4x8xf32>
    %63 = arith.truncf %62 : vector<4x8xf32> to vector<4x8xbf16>
    %64 = vector.extract_strided_slice %14 {offsets = [0, 80], sizes = [4, 8], strides = [1, 1]} : vector<4x96xf32> to vector<4x8xf32>
    %65 = arith.truncf %64 : vector<4x8xf32> to vector<4x8xbf16>
    %cst_27 = arith.constant dense<0.000000e+00> : vector<4x4xf32>
    %66 = tpu.matmul %61, %63, %cst_27 {dimension_numbers = #tpu.dot_dimension_numbers<[1], [1], [0], [0], [0, 0, 1, 0], [], []>} : vector<4x8xbf16>, vector<4x8xbf16>, vector<4x4xf32> -> vector<4x4xf32>
    %cst_28 = arith.constant dense<0xFF800000> : vector<4xf32>
    %67 = vector.multi_reduction <maximumf>, %66, %cst_28 [1] : vector<4x4xf32> to vector<4xf32>
    %68 = vector.shape_cast %67 : vector<4xf32> to vector<4x1xf32>
    %69 = vector.broadcast %68 : vector<4x1xf32> to vector<4x4xf32>
    %70 = arith.subf %66, %69 : vector<4x4xf32>
    %71 = math.exp %70 : vector<4x4xf32>
    %cst_29 = arith.constant dense<0.000000e+00> : vector<4xf32>
    %72 = vector.multi_reduction <add>, %71, %cst_29 [1] : vector<4x4xf32> to vector<4xf32>
    %73 = vector.shape_cast %72 : vector<4xf32> to vector<4x1xf32>
    %74 = vector.broadcast %73 : vector<4x1xf32> to vector<4x4xf32>
    %75 = arith.divf %71, %74 : vector<4x4xf32>
    %76 = arith.truncf %75 : vector<4x4xf32> to vector<4x4xbf16>
    %cst_30 = arith.constant dense<0.000000e+00> : vector<4x8xf32>
    %77 = tpu.matmul %76, %65, %cst_30 {dimension_numbers = #tpu.dot_dimension_numbers<[1], [0], [0], [1], [0, 0, 1, 1], [], []>} : vector<4x4xbf16>, vector<4x8xbf16>, vector<4x8xf32> -> vector<4x8xf32>
    %78 = arith.truncf %77 : vector<4x8xf32> to vector<4x8xbf16>
    %79 = vector.extract_strided_slice %13 {offsets = [16, 0], sizes = [8, 32], strides = [1, 1]} : vector<32x32xbf16> to vector<8x32xbf16>
    %cst_31 = arith.constant dense<0.000000e+00> : vector<4x32xf32>
    %80 = tpu.matmul %78, %79, %cst_31 {dimension_numbers = #tpu.dot_dimension_numbers<[1], [0], [0], [1], [0, 0, 1, 1], [], []>} : vector<4x8xbf16>, vector<8x32xbf16>, vector<4x32xf32> -> vector<4x32xf32>
    %81 = arith.addf %59, %80 : vector<4x32xf32>
    %82 = vector.extract_strided_slice %14 {offsets = [0, 24], sizes = [4, 8], strides = [1, 1]} : vector<4x96xf32> to vector<4x8xf32>
    %83 = arith.truncf %82 : vector<4x8xf32> to vector<4x8xbf16>
    %84 = vector.extract_strided_slice %14 {offsets = [0, 56], sizes = [4, 8], strides = [1, 1]} : vector<4x96xf32> to vector<4x8xf32>
    %85 = arith.truncf %84 : vector<4x8xf32> to vector<4x8xbf16>
    %86 = vector.extract_strided_slice %14 {offsets = [0, 88], sizes = [4, 8], strides = [1, 1]} : vector<4x96xf32> to vector<4x8xf32>
    %87 = arith.truncf %86 : vector<4x8xf32> to vector<4x8xbf16>
    %cst_32 = arith.constant dense<0.000000e+00> : vector<4x4xf32>
    %88 = tpu.matmul %83, %85, %cst_32 {dimension_numbers = #tpu.dot_dimension_numbers<[1], [1], [0], [0], [0, 0, 1, 0], [], []>} : vector<4x8xbf16>, vector<4x8xbf16>, vector<4x4xf32> -> vector<4x4xf32>
    %cst_33 = arith.constant dense<0xFF800000> : vector<4xf32>
    %89 = vector.multi_reduction <maximumf>, %88, %cst_33 [1] : vector<4x4xf32> to vector<4xf32>
    %90 = vector.shape_cast %89 : vector<4xf32> to vector<4x1xf32>
    %91 = vector.broadcast %90 : vector<4x1xf32> to vector<4x4xf32>
    %92 = arith.subf %88, %91 : vector<4x4xf32>
    %93 = math.exp %92 : vector<4x4xf32>
    %cst_34 = arith.constant dense<0.000000e+00> : vector<4xf32>
    %94 = vector.multi_reduction <add>, %93, %cst_34 [1] : vector<4x4xf32> to vector<4xf32>
    %95 = vector.shape_cast %94 : vector<4xf32> to vector<4x1xf32>
    %96 = vector.broadcast %95 : vector<4x1xf32> to vector<4x4xf32>
    %97 = arith.divf %93, %96 : vector<4x4xf32>
    %98 = arith.truncf %97 : vector<4x4xf32> to vector<4x4xbf16>
    %cst_35 = arith.constant dense<0.000000e+00> : vector<4x8xf32>
    %99 = tpu.matmul %98, %87, %cst_35 {dimension_numbers = #tpu.dot_dimension_numbers<[1], [0], [0], [1], [0, 0, 1, 1], [], []>} : vector<4x4xbf16>, vector<4x8xbf16>, vector<4x8xf32> -> vector<4x8xf32>
    %100 = arith.truncf %99 : vector<4x8xf32> to vector<4x8xbf16>
    %101 = vector.extract_strided_slice %13 {offsets = [24, 0], sizes = [8, 32], strides = [1, 1]} : vector<32x32xbf16> to vector<8x32xbf16>
    %cst_36 = arith.constant dense<0.000000e+00> : vector<4x32xf32>
    %102 = tpu.matmul %100, %101, %cst_36 {dimension_numbers = #tpu.dot_dimension_numbers<[1], [0], [0], [1], [0, 0, 1, 1], [], []>} : vector<4x8xbf16>, vector<8x32xbf16>, vector<4x32xf32> -> vector<4x32xf32>
    %103 = arith.addf %81, %102 : vector<4x32xf32>
    %c0_37 = arith.constant 0 : index
    %c0_38 = arith.constant 0 : index
    %104 = vector.load %arg7[%c0_37, %c0_38] : memref<1x32xf32, #tpu.memory_space<vmem>>, vector<1x32xf32>
    %105 = vector.broadcast %104 : vector<1x32xf32> to vector<4x32xf32>
    %106 = arith.addf %103, %105 : vector<4x32xf32>
    %107 = vector.extract_strided_slice %106 {offsets = [0, 0], sizes = [1, 32], strides = [1, 1]} : vector<4x32xf32> to vector<1x32xf32>
    %c0_39 = arith.constant 0 : index
    %c0_40 = arith.constant 0 : index
    %108 = vector.load %arg16[%c0_39, %c0_40] : memref<8x32xf32, #tpu.memory_space<vmem>>, vector<1x32xf32>
    tpu.vector_store %arg16[%c0_39, %c0_40], %107 {strides = array<i32>} : memref<8x32xf32, #tpu.memory_space<vmem>>, vector<1x32xf32>,
    %109 = vector.extract_strided_slice %106 {offsets = [1, 0], sizes = [1, 32], strides = [1, 1]} : vector<4x32xf32> to vector<1x32xf32>
    %c2 = arith.constant 2 : index
    %c0_41 = arith.constant 0 : index
    %110 = vector.load %arg16[%c2, %c0_41] : memref<8x32xf32, #tpu.memory_space<vmem>>, vector<1x32xf32>
    tpu.vector_store %arg16[%c2, %c0_41], %109 {strides = array<i32>} : memref<8x32xf32, #tpu.memory_space<vmem>>, vector<1x32xf32>,
    %111 = vector.extract_strided_slice %106 {offsets = [2, 0], sizes = [1, 32], strides = [1, 1]} : vector<4x32xf32> to vector<1x32xf32>
    %c4 = arith.constant 4 : index
    %c0_42 = arith.constant 0 : index
    %112 = vector.load %arg16[%c4, %c0_42] : memref<8x32xf32, #tpu.memory_space<vmem>>, vector<1x32xf32>
    tpu.vector_store %arg16[%c4, %c0_42], %111 {strides = array<i32>} : memref<8x32xf32, #tpu.memory_space<vmem>>, vector<1x32xf32>,
    %113 = vector.extract_strided_slice %106 {offsets = [3, 0], sizes = [1, 32], strides = [1, 1]} : vector<4x32xf32> to vector<1x32xf32>
    %c6 = arith.constant 6 : index
    %c0_43 = arith.constant 0 : index
    %114 = vector.load %arg16[%c6, %c0_43] : memref<8x32xf32, #tpu.memory_space<vmem>>, vector<1x32xf32>
    tpu.vector_store %arg16[%c6, %c0_43], %113 {strides = array<i32>} : memref<8x32xf32, #tpu.memory_space<vmem>>, vector<1x32xf32>,
    %c1 = arith.constant 1 : index
    %c0_44 = arith.constant 0 : index
    %115 = tpu.strided_load %arg15[%c1, %c0_44] {strides = array<i32: 2, 1>} : memref<8x96xf32, #tpu.memory_space<vmem>>, vector<4x96xf32>
    %cst_45 = arith.constant 0.000000e+00 : f32
    %116 = vector.broadcast %cst_45 : f32 to vector<4x32xf32>
    %117 = vector.extract_strided_slice %115 {offsets = [0, 0], sizes = [4, 8], strides = [1, 1]} : vector<4x96xf32> to vector<4x8xf32>
    %118 = arith.truncf %117 : vector<4x8xf32> to vector<4x8xbf16>
    %119 = vector.extract_strided_slice %115 {offsets = [0, 32], sizes = [4, 8], strides = [1, 1]} : vector<4x96xf32> to vector<4x8xf32>
    %120 = arith.truncf %119 : vector<4x8xf32> to vector<4x8xbf16>
    %121 = vector.extract_strided_slice %115 {offsets = [0, 64], sizes = [4, 8], strides = [1, 1]} : vector<4x96xf32> to vector<4x8xf32>
    %122 = arith.truncf %121 : vector<4x8xf32> to vector<4x8xbf16>
    %cst_46 = arith.constant dense<0.000000e+00> : vector<4x4xf32>
    %123 = tpu.matmul %118, %120, %cst_46 {dimension_numbers = #tpu.dot_dimension_numbers<[1], [1], [0], [0], [0, 0, 1, 0], [], []>} : vector<4x8xbf16>, vector<4x8xbf16>, vector<4x4xf32> -> vector<4x4xf32>
    %cst_47 = arith.constant dense<0xFF800000> : vector<4xf32>
    %124 = vector.multi_reduction <maximumf>, %123, %cst_47 [1] : vector<4x4xf32> to vector<4xf32>
    %125 = vector.shape_cast %124 : vector<4xf32> to vector<4x1xf32>
    %126 = vector.broadcast %125 : vector<4x1xf32> to vector<4x4xf32>
    %127 = arith.subf %123, %126 : vector<4x4xf32>
    %128 = math.exp %127 : vector<4x4xf32>
    %cst_48 = arith.constant dense<0.000000e+00> : vector<4xf32>
    %129 = vector.multi_reduction <add>, %128, %cst_48 [1] : vector<4x4xf32> to vector<4xf32>
    %130 = vector.shape_cast %129 : vector<4xf32> to vector<4x1xf32>
    %131 = vector.broadcast %130 : vector<4x1xf32> to vector<4x4xf32>
    %132 = arith.divf %128, %131 : vector<4x4xf32>
    %133 = arith.truncf %132 : vector<4x4xf32> to vector<4x4xbf16>
    %cst_49 = arith.constant dense<0.000000e+00> : vector<4x8xf32>
    %134 = tpu.matmul %133, %122, %cst_49 {dimension_numbers = #tpu.dot_dimension_numbers<[1], [0], [0], [1], [0, 0, 1, 1], [], []>} : vector<4x4xbf16>, vector<4x8xbf16>, vector<4x8xf32> -> vector<4x8xf32>
    %135 = arith.truncf %134 : vector<4x8xf32> to vector<4x8xbf16>
    %136 = vector.extract_strided_slice %13 {offsets = [0, 0], sizes = [8, 32], strides = [1, 1]} : vector<32x32xbf16> to vector<8x32xbf16>
    %cst_50 = arith.constant dense<0.000000e+00> : vector<4x32xf32>
    %137 = tpu.matmul %135, %136, %cst_50 {dimension_numbers = #tpu.dot_dimension_numbers<[1], [0], [0], [1], [0, 0, 1, 1], [], []>} : vector<4x8xbf16>, vector<8x32xbf16>, vector<4x32xf32> -> vector<4x32xf32>
    %138 = arith.addf %116, %137 : vector<4x32xf32>
    %139 = vector.extract_strided_slice %115 {offsets = [0, 8], sizes = [4, 8], strides = [1, 1]} : vector<4x96xf32> to vector<4x8xf32>
    %140 = arith.truncf %139 : vector<4x8xf32> to vector<4x8xbf16>
    %141 = vector.extract_strided_slice %115 {offsets = [0, 40], sizes = [4, 8], strides = [1, 1]} : vector<4x96xf32> to vector<4x8xf32>
    %142 = arith.truncf %141 : vector<4x8xf32> to vector<4x8xbf16>
    %143 = vector.extract_strided_slice %115 {offsets = [0, 72], sizes = [4, 8], strides = [1, 1]} : vector<4x96xf32> to vector<4x8xf32>
    %144 = arith.truncf %143 : vector<4x8xf32> to vector<4x8xbf16>
    %cst_51 = arith.constant dense<0.000000e+00> : vector<4x4xf32>
    %145 = tpu.matmul %140, %142, %cst_51 {dimension_numbers = #tpu.dot_dimension_numbers<[1], [1], [0], [0], [0, 0, 1, 0], [], []>} : vector<4x8xbf16>, vector<4x8xbf16>, vector<4x4xf32> -> vector<4x4xf32>
    %cst_52 = arith.constant dense<0xFF800000> : vector<4xf32>
    %146 = vector.multi_reduction <maximumf>, %145, %cst_52 [1] : vector<4x4xf32> to vector<4xf32>
    %147 = vector.shape_cast %146 : vector<4xf32> to vector<4x1xf32>
    %148 = vector.broadcast %147 : vector<4x1xf32> to vector<4x4xf32>
    %149 = arith.subf %145, %148 : vector<4x4xf32>
    %150 = math.exp %149 : vector<4x4xf32>
    %cst_53 = arith.constant dense<0.000000e+00> : vector<4xf32>
    %151 = vector.multi_reduction <add>, %150, %cst_53 [1] : vector<4x4xf32> to vector<4xf32>
    %152 = vector.shape_cast %151 : vector<4xf32> to vector<4x1xf32>
    %153 = vector.broadcast %152 : vector<4x1xf32> to vector<4x4xf32>
    %154 = arith.divf %150, %153 : vector<4x4xf32>
    %155 = arith.truncf %154 : vector<4x4xf32> to vector<4x4xbf16>
    %cst_54 = arith.constant dense<0.000000e+00> : vector<4x8xf32>
    %156 = tpu.matmul %155, %144, %cst_54 {dimension_numbers = #tpu.dot_dimension_numbers<[1], [0], [0], [1], [0, 0, 1, 1], [], []>} : vector<4x4xbf16>, vector<4x8xbf16>, vector<4x8xf32> -> vector<4x8xf32>
    %157 = arith.truncf %156 : vector<4x8xf32> to vector<4x8xbf16>
    %158 = vector.extract_strided_slice %13 {offsets = [8, 0], sizes = [8, 32], strides = [1, 1]} : vector<32x32xbf16> to vector<8x32xbf16>
    %cst_55 = arith.constant dense<0.000000e+00> : vector<4x32xf32>
    %159 = tpu.matmul %157, %158, %cst_55 {dimension_numbers = #tpu.dot_dimension_numbers<[1], [0], [0], [1], [0, 0, 1, 1], [], []>} : vector<4x8xbf16>, vector<8x32xbf16>, vector<4x32xf32> -> vector<4x32xf32>
    %160 = arith.addf %138, %159 : vector<4x32xf32>
    %161 = vector.extract_strided_slice %115 {offsets = [0, 16], sizes = [4, 8], strides = [1, 1]} : vector<4x96xf32> to vector<4x8xf32>
    %162 = arith.truncf %161 : vector<4x8xf32> to vector<4x8xbf16>
    %163 = vector.extract_strided_slice %115 {offsets = [0, 48], sizes = [4, 8], strides = [1, 1]} : vector<4x96xf32> to vector<4x8xf32>
    %164 = arith.truncf %163 : vector<4x8xf32> to vector<4x8xbf16>
    %165 = vector.extract_strided_slice %115 {offsets = [0, 80], sizes = [4, 8], strides = [1, 1]} : vector<4x96xf32> to vector<4x8xf32>
    %166 = arith.truncf %165 : vector<4x8xf32> to vector<4x8xbf16>
    %cst_56 = arith.constant dense<0.000000e+00> : vector<4x4xf32>
    %167 = tpu.matmul %162, %164, %cst_56 {dimension_numbers = #tpu.dot_dimension_numbers<[1], [1], [0], [0], [0, 0, 1, 0], [], []>} : vector<4x8xbf16>, vector<4x8xbf16>, vector<4x4xf32> -> vector<4x4xf32>
    %cst_57 = arith.constant dense<0xFF800000> : vector<4xf32>
    %168 = vector.multi_reduction <maximumf>, %167, %cst_57 [1] : vector<4x4xf32> to vector<4xf32>
    %169 = vector.shape_cast %168 : vector<4xf32> to vector<4x1xf32>
    %170 = vector.broadcast %169 : vector<4x1xf32> to vector<4x4xf32>
    %171 = arith.subf %167, %170 : vector<4x4xf32>
    %172 = math.exp %171 : vector<4x4xf32>
    %cst_58 = arith.constant dense<0.000000e+00> : vector<4xf32>
    %173 = vector.multi_reduction <add>, %172, %cst_58 [1] : vector<4x4xf32> to vector<4xf32>
    %174 = vector.shape_cast %173 : vector<4xf32> to vector<4x1xf32>
    %175 = vector.broadcast %174 : vector<4x1xf32> to vector<4x4xf32>
    %176 = arith.divf %172, %175 : vector<4x4xf32>
    %177 = arith.truncf %176 : vector<4x4xf32> to vector<4x4xbf16>
    %cst_59 = arith.constant dense<0.000000e+00> : vector<4x8xf32>
    %178 = tpu.matmul %177, %166, %cst_59 {dimension_numbers = #tpu.dot_dimension_numbers<[1], [0], [0], [1], [0, 0, 1, 1], [], []>} : vector<4x4xbf16>, vector<4x8xbf16>, vector<4x8xf32> -> vector<4x8xf32>
    %179 = arith.truncf %178 : vector<4x8xf32> to vector<4x8xbf16>
    %180 = vector.extract_strided_slice %13 {offsets = [16, 0], sizes = [8, 32], strides = [1, 1]} : vector<32x32xbf16> to vector<8x32xbf16>
    %cst_60 = arith.constant dense<0.000000e+00> : vector<4x32xf32>
    %181 = tpu.matmul %179, %180, %cst_60 {dimension_numbers = #tpu.dot_dimension_numbers<[1], [0], [0], [1], [0, 0, 1, 1], [], []>} : vector<4x8xbf16>, vector<8x32xbf16>, vector<4x32xf32> -> vector<4x32xf32>
    %182 = arith.addf %160, %181 : vector<4x32xf32>
    %183 = vector.extract_strided_slice %115 {offsets = [0, 24], sizes = [4, 8], strides = [1, 1]} : vector<4x96xf32> to vector<4x8xf32>
    %184 = arith.truncf %183 : vector<4x8xf32> to vector<4x8xbf16>
    %185 = vector.extract_strided_slice %115 {offsets = [0, 56], sizes = [4, 8], strides = [1, 1]} : vector<4x96xf32> to vector<4x8xf32>
    %186 = arith.truncf %185 : vector<4x8xf32> to vector<4x8xbf16>
    %187 = vector.extract_strided_slice %115 {offsets = [0, 88], sizes = [4, 8], strides = [1, 1]} : vector<4x96xf32> to vector<4x8xf32>
    %188 = arith.truncf %187 : vector<4x8xf32> to vector<4x8xbf16>
    %cst_61 = arith.constant dense<0.000000e+00> : vector<4x4xf32>
    %189 = tpu.matmul %184, %186, %cst_61 {dimension_numbers = #tpu.dot_dimension_numbers<[1], [1], [0], [0], [0, 0, 1, 0], [], []>} : vector<4x8xbf16>, vector<4x8xbf16>, vector<4x4xf32> -> vector<4x4xf32>
    %cst_62 = arith.constant dense<0xFF800000> : vector<4xf32>
    %190 = vector.multi_reduction <maximumf>, %189, %cst_62 [1] : vector<4x4xf32> to vector<4xf32>
    %191 = vector.shape_cast %190 : vector<4xf32> to vector<4x1xf32>
    %192 = vector.broadcast %191 : vector<4x1xf32> to vector<4x4xf32>
    %193 = arith.subf %189, %192 : vector<4x4xf32>
    %194 = math.exp %193 : vector<4x4xf32>
    %cst_63 = arith.constant dense<0.000000e+00> : vector<4xf32>
    %195 = vector.multi_reduction <add>, %194, %cst_63 [1] : vector<4x4xf32> to vector<4xf32>
    %196 = vector.shape_cast %195 : vector<4xf32> to vector<4x1xf32>
    %197 = vector.broadcast %196 : vector<4x1xf32> to vector<4x4xf32>
    %198 = arith.divf %194, %197 : vector<4x4xf32>
    %199 = arith.truncf %198 : vector<4x4xf32> to vector<4x4xbf16>
    %cst_64 = arith.constant dense<0.000000e+00> : vector<4x8xf32>
    %200 = tpu.matmul %199, %188, %cst_64 {dimension_numbers = #tpu.dot_dimension_numbers<[1], [0], [0], [1], [0, 0, 1, 1], [], []>} : vector<4x4xbf16>, vector<4x8xbf16>, vector<4x8xf32> -> vector<4x8xf32>
    %201 = arith.truncf %200 : vector<4x8xf32> to vector<4x8xbf16>
    %202 = vector.extract_strided_slice %13 {offsets = [24, 0], sizes = [8, 32], strides = [1, 1]} : vector<32x32xbf16> to vector<8x32xbf16>
    %cst_65 = arith.constant dense<0.000000e+00> : vector<4x32xf32>
    %203 = tpu.matmul %201, %202, %cst_65 {dimension_numbers = #tpu.dot_dimension_numbers<[1], [0], [0], [1], [0, 0, 1, 1], [], []>} : vector<4x8xbf16>, vector<8x32xbf16>, vector<4x32xf32> -> vector<4x32xf32>
    %204 = arith.addf %182, %203 : vector<4x32xf32>
    %c0_66 = arith.constant 0 : index
    %c0_67 = arith.constant 0 : index
    %205 = vector.load %arg7[%c0_66, %c0_67] : memref<1x32xf32, #tpu.memory_space<vmem>>, vector<1x32xf32>
    %206 = vector.broadcast %205 : vector<1x32xf32> to vector<4x32xf32>
    %207 = arith.addf %204, %206 : vector<4x32xf32>
    %208 = vector.extract_strided_slice %207 {offsets = [0, 0], sizes = [1, 32], strides = [1, 1]} : vector<4x32xf32> to vector<1x32xf32>
    %c1_68 = arith.constant 1 : index
    %c0_69 = arith.constant 0 : index
    %209 = vector.load %arg16[%c1_68, %c0_69] : memref<8x32xf32, #tpu.memory_space<vmem>>, vector<1x32xf32>
    tpu.vector_store %arg16[%c1_68, %c0_69], %208 {strides = array<i32>} : memref<8x32xf32, #tpu.memory_space<vmem>>, vector<1x32xf32>,
    %210 = vector.extract_strided_slice %207 {offsets = [1, 0], sizes = [1, 32], strides = [1, 1]} : vector<4x32xf32> to vector<1x32xf32>
    %c3 = arith.constant 3 : index
    %c0_70 = arith.constant 0 : index
    %211 = vector.load %arg16[%c3, %c0_70] : memref<8x32xf32, #tpu.memory_space<vmem>>, vector<1x32xf32>
    tpu.vector_store %arg16[%c3, %c0_70], %210 {strides = array<i32>} : memref<8x32xf32, #tpu.memory_space<vmem>>, vector<1x32xf32>,
    %212 = vector.extract_strided_slice %207 {offsets = [2, 0], sizes = [1, 32], strides = [1, 1]} : vector<4x32xf32> to vector<1x32xf32>
    %c5 = arith.constant 5 : index
    %c0_71 = arith.constant 0 : index
    %213 = vector.load %arg16[%c5, %c0_71] : memref<8x32xf32, #tpu.memory_space<vmem>>, vector<1x32xf32>
    tpu.vector_store %arg16[%c5, %c0_71], %212 {strides = array<i32>} : memref<8x32xf32, #tpu.memory_space<vmem>>, vector<1x32xf32>,
    %214 = vector.extract_strided_slice %207 {offsets = [3, 0], sizes = [1, 32], strides = [1, 1]} : vector<4x32xf32> to vector<1x32xf32>
    %c7 = arith.constant 7 : index
    %c0_72 = arith.constant 0 : index
    %215 = vector.load %arg16[%c7, %c0_72] : memref<8x32xf32, #tpu.memory_space<vmem>>, vector<1x32xf32>
    tpu.vector_store %arg16[%c7, %c0_72], %214 {strides = array<i32>} : memref<8x32xf32, #tpu.memory_space<vmem>>, vector<1x32xf32>,
    %cst_73 = arith.constant 0.000000e+00 : f32
    %216 = vector.broadcast %cst_73 : f32 to vector<2x128xf32>
    %c0_74 = arith.constant 0 : index
    %c0_75 = arith.constant 0 : index
    %217 = tpu.strided_load %arg16[%c0_74, %c0_75] {strides = array<i32: 4, 1>} : memref<8x32xf32, #tpu.memory_space<vmem>>, vector<2x32xf32>
    %218 = arith.truncf %217 : vector<2x32xf32> to vector<2x32xbf16>
    %c0_76 = arith.constant 0 : index
    %c0_77 = arith.constant 0 : index
    %219 = vector.load %arg8[%c0_76, %c0_77] : memref<128x128xbf16, #tpu.memory_space<vmem>>, vector<32x128xbf16>
    %cst_78 = arith.constant dense<0.000000e+00> : vector<2x128xf32>
    %220 = tpu.matmul %218, %219, %cst_78 {dimension_numbers = #tpu.dot_dimension_numbers<[1], [0], [0], [1], [0, 0, 1, 1], [], []>} : vector<2x32xbf16>, vector<32x128xbf16>, vector<2x128xf32> -> vector<2x128xf32>
    %221 = arith.addf %216, %220 : vector<2x128xf32>
    %c1_79 = arith.constant 1 : index
    %c0_80 = arith.constant 0 : index
    %222 = tpu.strided_load %arg16[%c1_79, %c0_80] {strides = array<i32: 4, 1>} : memref<8x32xf32, #tpu.memory_space<vmem>>, vector<2x32xf32>
    %223 = arith.truncf %222 : vector<2x32xf32> to vector<2x32xbf16>
    %c32 = arith.constant 32 : index
    %c0_81 = arith.constant 0 : index
    %224 = vector.load %arg8[%c32, %c0_81] : memref<128x128xbf16, #tpu.memory_space<vmem>>, vector<32x128xbf16>
    %cst_82 = arith.constant dense<0.000000e+00> : vector<2x128xf32>
    %225 = tpu.matmul %223, %224, %cst_82 {dimension_numbers = #tpu.dot_dimension_numbers<[1], [0], [0], [1], [0, 0, 1, 1], [], []>} : vector<2x32xbf16>, vector<32x128xbf16>, vector<2x128xf32> -> vector<2x128xf32>
    %226 = arith.addf %221, %225 : vector<2x128xf32>
    %c2_83 = arith.constant 2 : index
    %c0_84 = arith.constant 0 : index
    %227 = tpu.strided_load %arg16[%c2_83, %c0_84] {strides = array<i32: 4, 1>} : memref<8x32xf32, #tpu.memory_space<vmem>>, vector<2x32xf32>
    %228 = arith.truncf %227 : vector<2x32xf32> to vector<2x32xbf16>
    %c64 = arith.constant 64 : index
    %c0_85 = arith.constant 0 : index
    %229 = vector.load %arg8[%c64, %c0_85] : memref<128x128xbf16, #tpu.memory_space<vmem>>, vector<32x128xbf16>
    %cst_86 = arith.constant dense<0.000000e+00> : vector<2x128xf32>
    %230 = tpu.matmul %228, %229, %cst_86 {dimension_numbers = #tpu.dot_dimension_numbers<[1], [0], [0], [1], [0, 0, 1, 1], [], []>} : vector<2x32xbf16>, vector<32x128xbf16>, vector<2x128xf32> -> vector<2x128xf32>
    %231 = arith.addf %226, %230 : vector<2x128xf32>
    %c3_87 = arith.constant 3 : index
    %c0_88 = arith.constant 0 : index
    %232 = tpu.strided_load %arg16[%c3_87, %c0_88] {strides = array<i32: 4, 1>} : memref<8x32xf32, #tpu.memory_space<vmem>>, vector<2x32xf32>
    %233 = arith.truncf %232 : vector<2x32xf32> to vector<2x32xbf16>
    %c96 = arith.constant 96 : index
    %c0_89 = arith.constant 0 : index
    %234 = vector.load %arg8[%c96, %c0_89] : memref<128x128xbf16, #tpu.memory_space<vmem>>, vector<32x128xbf16>
    %cst_90 = arith.constant dense<0.000000e+00> : vector<2x128xf32>
    %235 = tpu.matmul %233, %234, %cst_90 {dimension_numbers = #tpu.dot_dimension_numbers<[1], [0], [0], [1], [0, 0, 1, 1], [], []>} : vector<2x32xbf16>, vector<32x128xbf16>, vector<2x128xf32> -> vector<2x128xf32>
    %236 = arith.addf %231, %235 : vector<2x128xf32>
    %c0_91 = arith.constant 0 : index
    %c0_92 = arith.constant 0 : index
    %237 = vector.load %arg9[%c0_91, %c0_92] : memref<1x128xf32, #tpu.memory_space<vmem>>, vector<1x128xf32>
    %238 = vector.broadcast %237 : vector<1x128xf32> to vector<2x128xf32>
    %239 = arith.addf %236, %238 : vector<2x128xf32>
    %cst_93 = arith.constant 0.000000e+00 : f32
    %240 = vector.broadcast %cst_93 : f32 to vector<2x128xf32>
    %241 = arith.cmpf oge, %239, %240 : vector<2x128xf32>
    %cst_94 = arith.constant 2.000000e-01 : f32
    %242 = vector.broadcast %cst_94 : f32 to vector<2x128xf32>
    %243 = arith.mulf %242, %239 : vector<2x128xf32>
    %244 = arith.select %241, %239, %243 : vector<2x128xi1>, vector<2x128xf32>
    %245 = arith.truncf %244 : vector<2x128xf32> to vector<2x128xbf16>
    %c0_95 = arith.constant 0 : index
    %c0_96 = arith.constant 0 : index
    %246 = vector.load %arg10[%c0_95, %c0_96] : memref<128x64xbf16, #tpu.memory_space<vmem>>, vector<128x64xbf16>
    %cst_97 = arith.constant dense<0.000000e+00> : vector<2x64xf32>
    %247 = tpu.matmul %245, %246, %cst_97 {dimension_numbers = #tpu.dot_dimension_numbers<[1], [0], [0], [1], [0, 0, 1, 1], [], []>} : vector<2x128xbf16>, vector<128x64xbf16>, vector<2x64xf32> -> vector<2x64xf32>
    %c0_98 = arith.constant 0 : index
    %c0_99 = arith.constant 0 : index
    %248 = vector.load %arg11[%c0_98, %c0_99] : memref<1x64xf32, #tpu.memory_space<vmem>>, vector<1x64xf32>
    %249 = vector.broadcast %248 : vector<1x64xf32> to vector<2x64xf32>
    %250 = arith.addf %247, %249 : vector<2x64xf32>
    %cst_100 = arith.constant 0.000000e+00 : f32
    %251 = vector.broadcast %cst_100 : f32 to vector<2x64xf32>
    %252 = arith.cmpf oge, %250, %251 : vector<2x64xf32>
    %cst_101 = arith.constant 2.000000e-01 : f32
    %253 = vector.broadcast %cst_101 : f32 to vector<2x64xf32>
    %254 = arith.mulf %253, %250 : vector<2x64xf32>
    %255 = arith.select %252, %250, %254 : vector<2x64xi1>, vector<2x64xf32>
    %c0_102 = arith.constant 0 : index
    %c0_103 = arith.constant 0 : index
    %256 = vector.load %arg12[%c0_102, %c0_103] : memref<1x64xbf16, #tpu.memory_space<vmem>>, vector<1x64xbf16>
    %257 = arith.truncf %255 : vector<2x64xf32> to vector<2x64xbf16>
    %cst_104 = arith.constant dense<0.000000e+00> : vector<1x2xf32>
    %258 = tpu.matmul %256, %257, %cst_104 {dimension_numbers = #tpu.dot_dimension_numbers<[1], [1], [0], [0], [0, 0, 1, 0], [], []>} : vector<1x64xbf16>, vector<2x64xbf16>, vector<1x2xf32> -> vector<1x2xf32>
    %c0_105 = arith.constant 0 : index
    %c0_106 = arith.constant 0 : index
    %259 = vector.load %arg13[%c0_105, %c0_106] : memref<1x1xf32, #tpu.memory_space<vmem>>, vector<1x1xf32>
    %260 = vector.broadcast %259 : vector<1x1xf32> to vector<1x2xf32>
    %261 = arith.addf %258, %260 : vector<1x2xf32>
    %c0_107 = arith.constant 0 : index
    %c0_108 = arith.constant 0 : index
    %262 = vector.load %arg14[%c0_107, %c0_108] : memref<1x2xf32, #tpu.memory_space<vmem>>, vector<1x2xf32>
    tpu.vector_store %arg14[%c0_107, %c0_108], %261 {strides = array<i32>} : memref<1x2xf32, #tpu.memory_space<vmem>>, vector<1x2xf32>,
    return
  }
  func.func @transform_0(%arg0: i32) -> (i32, i32) {
    %c0_i32 = arith.constant 0 : i32
    %c0_i32_0 = arith.constant 0 : i32
    %c0_i32_1 = arith.constant 0 : i32
    return %c0_i32, %c0_i32_0 : i32, i32
  }
  func.func @transform_1(%arg0: i32) -> (i32, i32) {
    %c0_i32 = arith.constant 0 : i32
    %c0_i32_0 = arith.constant 0 : i32
    %c0_i32_1 = arith.constant 0 : i32
    return %c0_i32, %c0_i32_0 : i32, i32
  }
  func.func @transform_2(%arg0: i32) -> (i32, i32) {
    %c0_i32 = arith.constant 0 : i32
    %c0_i32_0 = arith.constant 0 : i32
    %c0_i32_1 = arith.constant 0 : i32
    return %c0_i32, %c0_i32_0 : i32, i32
  }
  func.func @transform_3(%arg0: i32) -> (i32, i32) {
    %c0_i32 = arith.constant 0 : i32
    %c0_i32_0 = arith.constant 0 : i32
    %c0_i32_1 = arith.constant 0 : i32
    return %c0_i32, %c0_i32_0 : i32, i32
  }
  func.func @transform_4(%arg0: i32) -> (i32, i32) {
    %c0_i32 = arith.constant 0 : i32
    %c0_i32_0 = arith.constant 0 : i32
    %c0_i32_1 = arith.constant 0 : i32
    return %c0_i32, %c0_i32_0 : i32, i32
  }
  func.func @transform_5(%arg0: i32) -> (i32, i32) {
    %c0_i32 = arith.constant 0 : i32
    %c0_i32_0 = arith.constant 0 : i32
    %c0_i32_1 = arith.constant 0 : i32
    return %c0_i32, %c0_i32_0 : i32, i32
  }
  func.func @transform_6(%arg0: i32) -> (i32, i32) {
    %c0_i32 = arith.constant 0 : i32
    %c0_i32_0 = arith.constant 0 : i32
    %c0_i32_1 = arith.constant 0 : i32
    return %c0_i32, %c0_i32_0 : i32, i32
  }
  func.func @transform_7(%arg0: i32) -> (i32, i32) {
    %c0_i32 = arith.constant 0 : i32
    %c0_i32_0 = arith.constant 0 : i32
    %c0_i32_1 = arith.constant 0 : i32
    return %c0_i32, %c0_i32_0 : i32, i32
  }
  func.func @transform_8(%arg0: i32) -> (i32, i32) {
    %c0_i32 = arith.constant 0 : i32
    %c0_i32_0 = arith.constant 0 : i32
    %c0_i32_1 = arith.constant 0 : i32
    return %c0_i32, %c0_i32_0 : i32, i32
  }
  func.func @transform_9(%arg0: i32) -> (i32, i32) {
    %c0_i32 = arith.constant 0 : i32
    %c0_i32_0 = arith.constant 0 : i32
    %c0_i32_1 = arith.constant 0 : i32
    return %c0_i32, %c0_i32_0 : i32, i32
  }
  func.func @transform_10(%arg0: i32) -> (i32, i32) {
    %c0_i32 = arith.constant 0 : i32
    %c0_i32_0 = arith.constant 0 : i32
    %c0_i32_1 = arith.constant 0 : i32
    return %c0_i32, %c0_i32_0 : i32, i32
  }
  func.func @transform_11(%arg0: i32) -> (i32, i32) {
    %c0_i32 = arith.constant 0 : i32
    %c0_i32_0 = arith.constant 0 : i32
    %c0_i32_1 = arith.constant 0 : i32
    return %c0_i32, %c0_i32_0 : i32, i32
  }
  func.func @transform_12(%arg0: i32) -> (i32, i32) {
    %c0_i32 = arith.constant 0 : i32
    %c0_i32_0 = arith.constant 0 : i32
    %c0_i32_1 = arith.constant 0 : i32
    return %c0_i32, %c0_i32_0 : i32, i32
  }
  func.func @transform_13(%arg0: i32) -> (i32, i32) {
    %c0_i32 = arith.constant 0 : i32
    %c0_i32_0 = arith.constant 0 : i32
    %c0_i32_1 = arith.constant 0 : i32
    return %c0_i32, %c0_i32_0 : i32, i32
  }
}

</mosaic_0001>

<bundles_post_ra>
// kernel: user_rating_critic.1
= control target key start
LH: loop header
LB: loop body
LE: loop exit
PB: predicated region body
PF: predicated region fallthrough
CT: control target
= control target key end

     0   :  { %s3049_s0 = inlined_call_operand.vmem [shape: bf16[8,32], index: 0, kind: input, shape index: {}]   ;;  %s3050_s1 = inlined_call_operand.vmem [shape: bf16[32,32], index: 1, kind: input, shape index: {}]   ;;  %s3051_s2 = inlined_call_operand.vmem [shape: f32[1,32], index: 2, kind: input, shape index: {}]   ;;  %s3052_s3 = inlined_call_operand.vmem [shape: bf16[32,96], index: 3, kind: input, shape index: {}]   ;;  %s3053_s4 = inlined_call_operand.vmem [shape: f32[1,96], index: 4, kind: input, shape index: {}]   ;;  %s3054_s5 = inlined_call_operand.hbm [shape: bf16[32,32], index: 5, kind: input, shape index: {}]   ;;  %s3055_s6 = inlined_call_operand.hbm [shape: f32[1,32], index: 6, kind: input, shape index: {}]   ;;  %s3056_s7 = inlined_call_operand.vmem [shape: bf16[128,128], index: 7, kind: input, shape index: {}]   ;;  %s3057_s8 = inlined_call_operand.hbm [shape: f32[1,128], index: 8, kind: input, shape index: {}]   ;;  %s3058_s9 = inlined_call_operand.vmem [shape: bf16[128,64], index: 9, kind: input, shape index: {}]   ;;  %s3059_s10 = inlined_call_operand.hbm [shape: f32[1,64], index: 10, kind: input, shape index: {}]   ;;  %s3060_s11 = inlined_call_operand.hbm [shape: bf16[1,64], index: 11, kind: input, shape index: {}]   ;;  %s3061_s12 = inlined_call_operand.<no memory space> [shape: f32[1,1], index: 12, kind: input, shape index: {}]   ;;  %s3062_s13 = inlined_call_operand.hbm [shape: f32[1,2], index: 13, kind: output, shape index: {}]  }
   0x1   :  { %v18_v0 = vstv %s3061_s12 }
   0x2   :  { %19 = vst [vmem:[#allocation4] sm:$0x1] %v18_v0 }
   0x3   :  { %20 = vsyncpa [#allocation6], 0 }
   0x4   :  { %21 = vsyncpa [#allocation9], 0 }
   0x5   :  { %22 = vsyncpa [#allocation12], 0 }
   0x6   :  { %23 = vsyncpa [#allocation7], 0  ;;  %s2553_s27 = smov [#allocation8]   ;;  %s2554_s29 = smov [#allocation11]  }
   0x7   :  { %s52_s28 = sshll.u32 %s2553_s27, 4  ;;  %s76_s30 = sshll.u32 %s2554_s29, 4  ;;  %s53_s28 = int_to_ptr.vmem [resolvable:$true] %s52_s28  ;;  %s77_s30 = int_to_ptr.vmem [resolvable:$true] %s76_s30 }
   0x8   :  { %s2413_s16 = scalar_lea.hbm %s3055_s6, 16 }
   0x9   :  { %p2414_p0 = scmp.ne.s32.totalorder %s3055_s6, %s2413_s16  ;;  %p2417_p1 = scmp.lt.u32.totalorder %s2413_s16, %s3055_s6 }
   0xb   :  { %p2419_p2 = pnand %p2417_p1, %p2414_p0 }
   0xd   :  { %2422 = shalt.err (!%p2419_p2)
}
   0xe   :  { %s2423_s20 = scalar_lea.vmem %s53_s28, 16  ;;  %s2427_s21 = scalar_lea.vmem %s53_s28, 32 }
   0xf   :  { %p2424_p3 = scmp.ne.s32.totalorder %s53_s28, %s2423_s20  ;;  %p2428_p4 = scmp.lt.s32.totalorder %s53_s28, %s53_s28 }
  0x10   :  { %p2429_p5 = scmp.lt.s32.totalorder %s2427_s21, %s2423_s20 }
  0x12   :  { %p2430_p6 = por %p2429_p5, %p2428_p4 }
  0x14   :  { %p2431_p7 = pnand %p2430_p6, %p2424_p3 }
  0x16   :  { %2434 = shalt.err (!%p2431_p7)
}
  0x17   :  { %55 = dma.hbm_to_vmem [thread:$0]  %s3055_s6, 16, %s53_s28, [#allocation9]  }
  0x18   :  { %s2435_s26 = scalar_lea.hbm %s3059_s10, 16 }
  0x19   :  { %p2436_p8 = scmp.ne.s32.totalorder %s3059_s10, %s2435_s26  ;;  %p2439_p9 = scmp.lt.u32.totalorder %s2435_s26, %s3059_s10 }
  0x1b   :  { %p2441_p10 = pnand %p2439_p9, %p2436_p8 }
  0x1d   :  { %2444 = shalt.err (!%p2441_p10)
}
  0x1e   :  { %s2445_s16 = scalar_lea.vmem %s77_s30, 16  ;;  %s2449_s17 = scalar_lea.vmem %s77_s30, 32 }
  0x1f   :  { %p2446_p11 = scmp.ne.s32.totalorder %s77_s30, %s2445_s16  ;;  %p2450_p12 = scmp.lt.s32.totalorder %s77_s30, %s77_s30 }
  0x20   :  { %p2451_p13 = scmp.lt.s32.totalorder %s2449_s17, %s2445_s16 }
  0x22   :  { %p2452_p0 = por %p2451_p13, %p2450_p12 }
  0x24   :  { %p2453_p1 = pnand %p2452_p0, %p2446_p11 }
  0x26   :  { %2456 = shalt.err (!%p2453_p1)
}
  0x27   :  { %79 = dma.hbm_to_vmem [thread:$0]  %s3059_s10, 16, %s77_s30, [#allocation12]  }
  0x28   :  { %s2555_s18 = smov [#allocation5]   ;;  %s2457_s21 = scalar_lea.hbm %s3054_s5, 256 }
  0x29   :  { %s39_s12 = sshll.u32 %s2555_s18, 4  ;;  %p2458_p2 = scmp.ne.s32.totalorder %s3054_s5, %s2457_s21  ;;  %s40_s12 = int_to_ptr.vmem [resolvable:$true] %s39_s12 }
  0x2a   :  { %p2461_p3 = scmp.lt.u32.totalorder %s2457_s21, %s3054_s5 }
  0x2c   :  { %p2463_p4 = pnand %p2461_p3, %p2458_p2 }
  0x2e   :  { %2466 = shalt.err (!%p2463_p4)
}
  0x2f   :  { %s2467_s26 = scalar_lea.vmem %s40_s12, 256  ;;  %p2472_p6 = scmp.lt.s32.totalorder %s40_s12, %s40_s12 }
  0x30   :  { %p2468_p5 = scmp.ne.s32.totalorder %s40_s12, %s2467_s26  ;;  %p2473_p7 = scmp.lt.s32.totalorder %s2467_s26, %s2467_s26 }
  0x32   :  { %p2474_p8 = por %p2473_p7, %p2472_p6 }
  0x34   :  { %p2475_p9 = pnand %p2474_p8, %p2468_p5 }
  0x36   :  { %2478 = shalt.err (!%p2475_p9)
}
  0x37   :  { %s2556_s10 = smov 64   ;;  %s2557_s30 = smov 4  }
  0x38   :  { %45 = dma.hbm_to_vmem [thread:$0]  %s3054_s5, 256, %s40_s12, [#allocation6], %s2556_s10, %s2556_s10, %s2557_s30  }
  0x39   :  { %s2558_s14 = smov [#allocation10]   ;;  %s2559_s16 = smov [#allocation13]  }
  0x3a   :  { %s64_s15 = sshll.u32 %s2558_s14, 4  ;;  %s86_s17 = sshll.u32 %s2559_s16, 4  ;;  %s65_s15 = int_to_ptr.vmem [resolvable:$true] %s64_s15  ;;  %s87_s17 = int_to_ptr.vmem [resolvable:$true] %s86_s17 }
  0x3b   :  { %s2479_s18 = scalar_lea.hbm %s3057_s8, 16 }
  0x3c   :  { %p2480_p10 = scmp.ne.s32.totalorder %s3057_s8, %s2479_s18  ;;  %p2483_p11 = scmp.lt.u32.totalorder %s2479_s18, %s3057_s8 }
  0x3e   :  { %p2485_p12 = pnand %p2483_p11, %p2480_p10 }
  0x40   :  { %2488 = shalt.err (!%p2485_p12)
}
  0x41   :  { %s2489_s5 = scalar_lea.vmem %s65_s15, 16  ;;  %s2493_s12 = scalar_lea.vmem %s65_s15, 32 }
  0x42   :  { %p2490_p13 = scmp.ne.s32.totalorder %s65_s15, %s2489_s5  ;;  %p2494_p0 = scmp.lt.s32.totalorder %s65_s15, %s65_s15 }
  0x43   :  { %p2495_p1 = scmp.lt.s32.totalorder %s2493_s12, %s2489_s5 }
  0x45   :  { %p2496_p2 = por %p2495_p1, %p2494_p0 }
  0x47   :  { %p2497_p3 = pnand %p2496_p2, %p2490_p13 }
  0x49   :  { %2500 = shalt.err (!%p2497_p3)
}
  0x4a   :  { %67 = dma.hbm_to_vmem [thread:$0]  %s3057_s8, 16, %s65_s15, [#allocation9]  }
  0x4b   :  { %s2501_s30 = scalar_lea.hbm %s3060_s11, 16 }
  0x4c   :  { %p2502_p4 = scmp.ne.s32.totalorder %s3060_s11, %s2501_s30  ;;  %p2505_p5 = scmp.lt.u32.totalorder %s2501_s30, %s3060_s11 }
  0x4e   :  { %p2507_p6 = pnand %p2505_p5, %p2502_p4 }
  0x50   :  { %2510 = shalt.err (!%p2507_p6)
}
  0x51   :  { %s2511_s6 = scalar_lea.vmem %s87_s17, 16  ;;  %s2515_s28 = scalar_lea.vmem %s87_s17, 32 }
  0x52   :  { %p2512_p7 = scmp.ne.s32.totalorder %s87_s17, %s2511_s6  ;;  %p2516_p8 = scmp.lt.s32.totalorder %s87_s17, %s87_s17 }
  0x53   :  { %p2517_p9 = scmp.lt.s32.totalorder %s2515_s28, %s2511_s6 }
  0x55   :  { %p2518_p10 = por %p2517_p9, %p2516_p8 }
  0x57   :  { %p2519_p11 = pnand %p2518_p10, %p2512_p7 }
  0x59   :  { %2522 = shalt.err (!%p2519_p11)
}
  0x5a   :  { %89 = dma.hbm_to_vmem [thread:$0]  %s3060_s11, 16, %s87_s17, [#allocation12]  }
  0x5b   :  { %2545 = dma.done.wait [#allocation6], 256  }
  0x5c   :  { %2546 = vsyncadd [#allocation6], 4294967040 }
  0x5d   :  { %2547 = dma.done.wait [#allocation9], 32  }
  0x5e   :  { %2548 = vsyncadd [#allocation9], 4294967264 }
  0x5f   :  { %2549 = dma.done.wait [#allocation12], 32  }
  0x60   :  { %2550 = vsyncadd [#allocation12], 4294967264  ;;  %v2560_v1 = vmov 0.0   ;;  %vm2561_vm0 = vmmov 0   ;;  %v2361_v2 = vld [vmem:[%s3050_s1] sm:$0xff]   ;;  %v2362_v3 = vld [vmem:[%s3050_s1 + $0x8] sm:$0xff]  }
  0x61   :  { %2120 = vmatprep.subr.bf16.mxu1 %v2560_v1  ;;  %2124 = vmatprep.mubr.msk.bf16.mxu1 %vm2561_vm0, %v2560_v1  ;;  %vm132_vm1 = vcmask 261120   ;;  %v108_v4 = vld [vmem:[%s3049_s0] sm:$0xf]  ;;  %v2364_v6 = vld [vmem:[%s3052_s3 + $0x8] sm:$0xff]   ;;  %vm243_vm2 = vcmask 785408   ;;  %s2563_s25 = smov 96  }
  0x62   :  { %2136 = vmatprep.subr.bf16.mxu0 %v2560_v1  ;;  %2138 = vmatprep.mubr.msk.bf16.mxu0 %vm2561_vm0, %v2560_v1  ;;  %v2363_v5 = vld [vmem:[%s3052_s3] sm:$0xff]   ;;  %s2564_s26 = smov 88   ;;  %vm254_vm3 = vcmask 64512   ;;  %vm301_vm4 = vcmask 27648   ;;  %s2566_s30 = smov 112   ;;  %vm320_vm5 = vcmask 1041408  }
  0x63   :  { %2121 = vmatpush3.bf16.msra.mxu1 %v2361_v2  ;;  %v1986_v7 = vld [vmem:[%s3051_s2] ss:$0 sm:$0xff]  ;;  %s2562_s2 = smov 120   ;;  %s2567_s27 = smov 80   ;;  %vm316_vm6 = vcmask 31744   ;;  %vm479_vm7 = vcmask 1043456  }
  0x64   :  { %2122 = vmatprep.subr.bf16.mxu1 %v2560_v1  ;;  %v1990_v14 = vld [vmem:[%s3053_s4] ss:$0 sm:$0xff]  ;;  %s2565_s4 = smov 56   ;;  %v245_v59 = vld [vmem:[#allocation5] sm:$0xf]  ;;  %s2568_s29 = smov 72  }
  0x65   :  { %v2788_v60 = vsel %vm479_vm7, %v245_v59, 0  ;;  %v246_v61 = vld [vmem:[#allocation5 + $0x4] sm:$0xf]  ;;  %s2569_s14 = smov 104   ;;  %s2570_s16 = smov 48   ;;  %vm893_vm8 = vcmask 253952  }
  0x66   :  { %v2792_v62 = vsel %vm479_vm7, %v246_v61, 0  ;;  %s2571_s6 = smov 40   ;;  %vm895_vm9 = vcmask 254977   ;;  %vm897_vm10 = vcmask 256002   ;;  %vm899_vm11 = vcmask 257027  }
  0x67   :  { %2123 = vmatpush3.bf16.msra.mxu1 %v2362_v3  ;;  %vm1920_vm14 = vcmask 523264   ;;  %vm1967_vm15 = vcmask 8192  }
  0x68   :  { %2128 = vmatprep.subr.bf16.mxu1 %v2560_v1 }
  0x6a   :  { %2125 = vmatmul.mubr.msk.bf16.vlgmr.msra.gmra.mrb[0].mxu1 %vm132_vm1, %v108_v4 }
  0x6b   :  { %2129 = vmatpush3.bf16.msra.mxu1 %v2363_v5  ;;  %2132 = vmatprep.mubr.msk.bf16.mxu1 %vm2561_vm0, %v2560_v1 }
  0x6c   :  { %2130 = vmatprep.subr.bf16.mxu1 %v2560_v1 }
  0x6f   :  { %2131 = vmatpush3.bf16.msra.mxu1 %v2364_v6 }
  0x70   :  { %2142 = vmatprep.subr.bf16.mxu1 %v2560_v1 }
 0x13d   :  { %v170_v8 = vpop.f32.mrb[0].mxu1 }
 0x13e   :  { %v171_v9 = vadd.f32 %v1986_v7, %v170_v8  ;;  %v2126_v10 = vpop.f32.mrb[1].mxu1 }
 0x13f   :  { %v173_v11 = vpop.f32.mrb[2].mxu1 }
 0x140   :  { %v176_v12 = vpack.c.bf16 %v171_v9, %v171_v9  ;;  %v2127_v13 = vpop.f32.mrb[3].mxu1 }
 0x142   :  { %2133 = vmatmul.mubr.msk.bf16.vlgmr.msra.gmra.mrb[4].mxu1 %vm132_vm1, %v176_v12 }
 0x143   :  { %2144 = vmatprep.mubr.msk.bf16.mxu1 %vm2561_vm0, %v2560_v1 }
 0x215   :  { %v237_v15 = vpop.f32.mrb[4].mxu1 }
 0x216   :  { %v238_v16 = vadd.f32 %v1990_v14, %v237_v15  ;;  %v2134_v17 = vpop.f32.mrb[5].mxu1 }
 0x217   :  { %v240_v18 = vpop.f32.mrb[6].mxu1 }
 0x218   :  { %244 = vst.msk [vmem:[#allocation2] sm:$0xff] %vm243_vm2, %v238_v16  ;;  %v2135_v19 = vpop.f32.mrb[7].mxu1 }
 0x21f   :  { %v249_v20 = vld [vmem:[#allocation2] ss:$2 sm:$0xf] }
 0x220   :  { %v2746_v21 = vpack.c.bf16 %v249_v20, %v249_v20 }
 0x222   :  { %365 = vrot.lane.b32.xlu1 %v2746_v21, %s2562_s2  ;;  %252 = vrot.lane.b32.xlu0 %v2746_v21, %s2563_s25 }
 0x226   :  { %367 = vrot.lane.b32.xlu0 %v2746_v21, %s2564_s26 }
 0x294   :  { %v253_v22 = vpop.permute.xlu0 %252  ;;  %v366_v26 = vpop.permute.xlu1 %365 }
 0x295   :  { %v259_v23 = vsel %vm254_vm3, %v253_v22, 0 }
 0x296   :  { %2137 = vmatpush3.bf16.xpose.msra.mxu0 %v259_v23 }
 0x297   :  { %2148 = vmatprep.subr.bf16.mxu0 %v2560_v1 }
 0x298   :  { %v368_v24 = vpop.permute.xlu0 %367 }
 0x299   :  { %v373_v25 = vsel %vm254_vm3, %v368_v24, 0 }
 0x29d   :  { %2139 = vmatmul.mubr.msk.bf16.vlgmr.msra.gmra.mrb[0].mxu0 %vm254_vm3, %v2746_v21 }
 0x29e   :  { %2149 = vmatpush3.bf16.xpose.msra.mxu0 %v373_v25  ;;  %2150 = vmatprep.mubr.msk.bf16.mxu0 %vm2561_vm0, %v2560_v1 }
 0x29f   :  { %2160 = vmatprep.subr.bf16.mxu0 %v2560_v1 }
 0x2a5   :  { %2151 = vmatmul.mubr.msk.bf16.vlgmr.msra.gmra.mrb[4].mxu0 %vm254_vm3, %v366_v26 }
 0x2a6   :  { %2162 = vmatprep.mubr.msk.bf16.mxu0 %vm2561_vm0, %v2560_v1  ;;  %2161 = vmatpush3.bf16.msra.mxu0 %v2792_v62 }
 0x2a7   :  { %2172 = vmatprep.subr.bf16.mxu0 %v2560_v1 }
 0x370   :  { %v295_v27 = vpop.f32.mrb[0].mxu0 }
 0x371   :  { %v2140_v28 = vpop.f32.mrb[1].mxu0  ;;  %v302_v29 = vsel %vm301_vm4, %v295_v27, -inf }
 0x372   :  { %303 = vmax.xlane.f32.xlu1 %v302_v29  ;;  %v298_v30 = vpop.f32.mrb[2].mxu0 }
 0x373   :  { %v2141_v31 = vpop.f32.mrb[3].mxu0 }
 0x378   :  { %v409_v32 = vpop.f32.mrb[4].mxu0 }
 0x379   :  { %v2152_v33 = vpop.f32.mrb[5].mxu0  ;;  %v415_v34 = vsel %vm301_vm4, %v409_v32, -inf }
 0x37a   :  { %416 = vmax.xlane.f32.xlu0 %v415_v34  ;;  %v412_v35 = vpop.f32.mrb[6].mxu0 }
 0x37b   :  { %v2153_v36 = vpop.f32.mrb[7].mxu0 }
 0x3ff   :  { %v304_v37 = vpop.xlane.xlu1 %303 }
 0x400   :  { %v305_v38 = vsub.f32 %v295_v27, %v304_v37 }
 0x402   :  { %v306_v39 = vmul.f32 1.442695, %v305_v38 }
 0x404   :  { %2381 = vpow2.f32 %v306_v39 }
 0x407   :  { %v417_v40 = vpop.xlane.xlu0 %416 }
 0x408   :  { %v418_v41 = vsub.f32 %v409_v32, %v417_v40 }
 0x40a   :  { %v419_v42 = vmul.f32 1.442695, %v418_v41 }
 0x40c   :  { %2383 = vpow2.f32 %v419_v42  ;;  %v247_v42 = vld [vmem:[#allocation5 + $0x8] sm:$0xf] }
 0x40e   :  { %v2382_v43 = vpop.eup %2381 }
 0x40f   :  { %v308_v44 = vsel %vm301_vm4, %v2382_v43, 0.0 }
 0x410   :  { %309 = vadd.xlane.f32.xlu0 %v308_v44 }
 0x416   :  { %v2384_v45 = vpop.eup %2383 }
 0x417   :  { %v421_v46 = vsel %vm301_vm4, %v2384_v45, 0.0 }
 0x418   :  { %422 = vadd.xlane.f32.xlu1 %v421_v46 }
 0x426   :  { %314 = vrot.lane.b32.xlu0 %v2746_v21, %s2556_s10 }
 0x429   :  { %427 = vrot.lane.b32.xlu1 %v2746_v21, %s2565_s4 }
 0x42a   :  { %569 = vrot.lane.b32.xlu0 %v2746_v21, %s2566_s30 }
 0x42d   :  { %571 = vrot.lane.b32.xlu1 %v2746_v21, %s2567_s27 }
 0x49d   :  { %v310_v47 = vpop.xlane.xlu0 %309 }
 0x49e   :  { %2385 = vrcp.f32 %v310_v47 }
 0x4a1   :  { %v315_v48 = vpop.permute.xlu0 %314 }
 0x4a2   :  { %v322_v49 = vsel %vm320_vm5, %v315_v48, 0 }
 0x4a3   :  { %2143 = vmatpush3.bf16.msra.mxu1 %v322_v49 }
 0x4a4   :  { %2154 = vmatprep.subr.bf16.mxu1 %v2560_v1 }
 0x4a5   :  { %v423_v50 = vpop.xlane.xlu1 %422  ;;  %v570_v12 = vpop.permute.xlu0 %569 }
 0x4a6   :  { %2387 = vrcp.f32 %v423_v50 }
 0x4a8   :  { %v2386_v51 = vpop.eup %2385 }
 0x4a9   :  { %v312_v52 = vmul.f32 %v2386_v51, %v2382_v43  ;;  %v428_v53 = vpop.permute.xlu1 %427  ;;  %v2829_v43 = vsel %vm479_vm7, %v247_v42, 0 }
 0x4aa   :  { %v433_v55 = vsel %vm320_vm5, %v428_v53, 0 }
 0x4ab   :  { %v313_v54 = vpack.c.bf16 %v312_v52, %v312_v52 }
 0x4ad   :  { %2145 = vmatmul.mubr.msk.bf16.vlgmr.msra.gmra.mrb[8].mxu1 %vm316_vm6, %v313_v54  ;;  %v572_v5 = vpop.permute.xlu1 %571  ;;  %v902_v54 = vld [vmem:[#allocation2 + $0x1] ss:$2 sm:$0xf] }
 0x4ae   :  { %2155 = vmatpush3.bf16.msra.mxu1 %v433_v55  ;;  %2156 = vmatprep.mubr.msk.bf16.mxu1 %vm2561_vm0, %v2560_v1  ;;  %v577_v10 = vsel %vm254_vm3, %v572_v5, 0  ;;  %v2839_v55 = vpack.c.bf16 %v902_v54, %v902_v54 }
 0x4af   :  { %2166 = vmatprep.subr.bf16.mxu1 %v2560_v1 }
 0x4b0   :  { %v2388_v56 = vpop.eup %2387 }
 0x4b1   :  { %v425_v57 = vmul.f32 %v2388_v56, %v2384_v45 }
 0x4b3   :  { %v426_v58 = vpack.c.bf16 %v425_v57, %v425_v57 }
 0x4b5   :  { %2157 = vmatmul.mubr.msk.bf16.vlgmr.msra.gmra.mrb[12].mxu1 %vm316_vm6, %v426_v58 }
 0x4b6   :  { %2168 = vmatprep.mubr.msk.bf16.mxu1 %vm2561_vm0, %v2560_v1  ;;  %2167 = vmatpush3.bf16.msra.mxu1 %v2788_v60 }
 0x4b7   :  { %2178 = vmatprep.subr.bf16.mxu1 %v2560_v1 }
 0x580   :  { %v358_v63 = vpop.f32.mrb[8].mxu1 }
 0x581   :  { %v364_v0 = vpack.c.bf16 %v358_v63, %v358_v63  ;;  %v2146_v2 = vpop.f32.mrb[9].mxu1 }
 0x582   :  { %v361_v3 = vpop.f32.mrb[10].mxu1 }
 0x583   :  { %v2147_v4 = vpop.f32.mrb[11].mxu1  ;;  %2169 = vmatmul.mubr.msk.bf16.vlgmr.msra.gmra.mrb[16].mxu1 %vm254_vm3, %v364_v0 }
 0x584   :  { %2180 = vmatprep.mubr.msk.bf16.mxu1 %vm2561_vm0, %v2560_v1 }
 0x588   :  { %v469_v6 = vpop.f32.mrb[12].mxu1 }
 0x589   :  { %v475_v7 = vpack.c.bf16 %v469_v6, %v469_v6  ;;  %v2158_v8 = vpop.f32.mrb[13].mxu1 }
 0x58a   :  { %v472_v9 = vpop.f32.mrb[14].mxu1 }
 0x58b   :  { %v2159_v11 = vpop.f32.mrb[15].mxu1  ;;  %2163 = vmatmul.mubr.msk.bf16.vlgmr.msra.gmra.mrb[8].mxu0 %vm254_vm3, %v475_v7 }
 0x58c   :  { %2173 = vmatpush3.bf16.xpose.msra.mxu0 %v577_v10  ;;  %2174 = vmatprep.mubr.msk.bf16.mxu0 %vm2561_vm0, %v2560_v1 }
 0x58d   :  { %2184 = vmatprep.subr.bf16.mxu0 %v2560_v1 }
 0x593   :  { %2175 = vmatmul.mubr.msk.bf16.vlgmr.msra.gmra.mrb[12].mxu0 %vm254_vm3, %v570_v12 }
 0x594   :  { %2186 = vmatprep.mubr.msk.bf16.mxu0 %vm2561_vm0, %v2560_v1  ;;  %2185 = vmatpush3.bf16.msra.mxu0 %v2829_v43 }
 0x595   :  { %2196 = vmatprep.subr.bf16.mxu0 %v2560_v1 }
 0x656   :  { %v563_v13 = vpop.f32.mrb[16].mxu1 }
 0x657   :  { %v2170_v14 = vpop.f32.mrb[17].mxu1 }
 0x658   :  { %v566_v15 = vpop.f32.mrb[18].mxu1 }
 0x659   :  { %v2171_v16 = vpop.f32.mrb[19].mxu1  ;;  %v248_v15 = vld [vmem:[#allocation5 + $0xc] sm:$0xf] }
 0x65a   :  { %v2870_v16 = vsel %vm479_vm7, %v248_v15, 0 }
 0x65e   :  { %v517_v17 = vpop.f32.mrb[8].mxu0 }
 0x65f   :  { %v2808_v18 = vadd.f32 %v563_v13, %v517_v17  ;;  %v2164_v19 = vpop.f32.mrb[9].mxu0 }
 0x660   :  { %v520_v20 = vpop.f32.mrb[10].mxu0 }
 0x661   :  { %v2165_v22 = vpop.f32.mrb[11].mxu0 }
 0x666   :  { %v613_v23 = vpop.f32.mrb[12].mxu0 }
 0x667   :  { %v2176_v24 = vpop.f32.mrb[13].mxu0  ;;  %v619_v25 = vsel %vm301_vm4, %v613_v23, -inf }
 0x668   :  { %620 = vmax.xlane.f32.xlu1 %v619_v25  ;;  %v616_v26 = vpop.f32.mrb[14].mxu0 }
 0x669   :  { %v2177_v27 = vpop.f32.mrb[15].mxu0 }
 0x679   :  { %729 = vrot.lane.b32.xlu1 %v2746_v21, %s2568_s29 }
 0x67d   :  { %727 = vrot.lane.b32.xlu1 %v2746_v21, %s2569_s14 }
 0x6f5   :  { %v621_v28 = vpop.xlane.xlu1 %620 }
 0x6f6   :  { %v622_v29 = vsub.f32 %v613_v23, %v621_v28 }
 0x6f8   :  { %v623_v30 = vmul.f32 1.442695, %v622_v29 }
 0x6f9   :  { %v730_v38 = vpop.permute.xlu1 %729 }
 0x6fa   :  { %2389 = vpow2.f32 %v623_v30  ;;  %v735_v40 = vsel %vm254_vm3, %v730_v38, 0 }
 0x6fd   :  { %v728_v41 = vpop.permute.xlu1 %727 }
 0x704   :  { %v2390_v31 = vpop.eup %2389 }
 0x705   :  { %v625_v32 = vsel %vm301_vm4, %v2390_v31, 0.0 }
 0x706   :  { %626 = vadd.xlane.f32.xlu0 %v625_v32 }
 0x71c   :  { %631 = vrot.lane.b32.xlu0 %v2746_v21, %s2570_s16 }
 0x793   :  { %v627_v33 = vpop.xlane.xlu0 %626 }
 0x794   :  { %2391 = vrcp.f32 %v627_v33 }
 0x797   :  { %v632_v34 = vpop.permute.xlu0 %631 }
 0x798   :  { %v637_v35 = vsel %vm320_vm5, %v632_v34, 0 }
 0x799   :  { %2179 = vmatpush3.bf16.msra.mxu1 %v637_v35 }
 0x79a   :  { %2190 = vmatprep.subr.bf16.mxu1 %v2560_v1 }
 0x79e   :  { %v2392_v36 = vpop.eup %2391 }
 0x79f   :  { %v629_v37 = vmul.f32 %v2392_v36, %v2390_v31 }
 0x7a1   :  { %v630_v39 = vpack.c.bf16 %v629_v37, %v629_v37 }
 0x7a3   :  { %2181 = vmatmul.mubr.msk.bf16.vlgmr.msra.gmra.mrb[20].mxu1 %vm316_vm6, %v630_v39 }
 0x7a4   :  { %2191 = vmatpush3.bf16.xpose.msra.mxu1 %v735_v40  ;;  %2192 = vmatprep.mubr.msk.bf16.mxu1 %vm2561_vm0, %v2560_v1 }
 0x7a5   :  { %2202 = vmatprep.subr.bf16.mxu1 %v2560_v1 }
 0x7ab   :  { %2193 = vmatmul.mubr.msk.bf16.vlgmr.msra.gmra.mrb[24].mxu1 %vm254_vm3, %v728_v41 }
 0x7ac   :  { %2204 = vmatprep.mubr.msk.bf16.mxu1 %vm2561_vm0, %v2560_v1  ;;  %2203 = vmatpush3.bf16.msra.mxu1 %v2870_v16 }
 0x7ad   :  { %2214 = vmatprep.subr.bf16.mxu1 %v2560_v1 }
 0x876   :  { %v673_v44 = vpop.f32.mrb[20].mxu1 }
 0x877   :  { %v679_v45 = vpack.c.bf16 %v673_v44, %v673_v44  ;;  %v2182_v46 = vpop.f32.mrb[21].mxu1 }
 0x878   :  { %v676_v47 = vpop.f32.mrb[22].mxu1  ;;  %v2891_v46 = vld [vmem:[#allocation8] ss:$0 sm:$0xff] }
 0x879   :  { %v2183_v48 = vpop.f32.mrb[23].mxu1  ;;  %2187 = vmatmul.mubr.msk.bf16.vlgmr.msra.gmra.mrb[16].mxu0 %vm254_vm3, %v679_v45 }
 0x87a   :  { %2198 = vmatprep.mubr.msk.bf16.mxu0 %vm2561_vm0, %v2560_v1 }
 0x87e   :  { %v771_v49 = vpop.f32.mrb[24].mxu1 }
 0x87f   :  { %v2194_v50 = vpop.f32.mrb[25].mxu1  ;;  %v777_v51 = vsel %vm301_vm4, %v771_v49, -inf }
 0x880   :  { %778 = vmax.xlane.f32.xlu0 %v777_v51  ;;  %v774_v52 = vpop.f32.mrb[26].mxu1 }
 0x881   :  { %v2195_v53 = vpop.f32.mrb[27].mxu1 }
 0x896   :  { %789 = vrot.lane.b32.xlu0 %v2746_v21, %s2571_s6 }
 0x89a   :  { %1016 = vrot.lane.b32.xlu0 %v2839_v55, %s2564_s26 }
 0x90d   :  { %v779_v56 = vpop.xlane.xlu0 %778 }
 0x90e   :  { %v780_v57 = vsub.f32 %v771_v49, %v779_v56 }
 0x910   :  { %v781_v58 = vmul.f32 1.442695, %v780_v57 }
 0x911   :  { %v790_v59 = vpop.permute.xlu0 %789 }
 0x912   :  { %2393 = vpow2.f32 %v781_v58  ;;  %v795_v61 = vsel %vm320_vm5, %v790_v59, 0 }
 0x913   :  { %2197 = vmatpush3.bf16.msra.mxu0 %v795_v61 }
 0x914   :  { %2208 = vmatprep.subr.bf16.mxu0 %v2560_v1 }
 0x915   :  { %v1017_v12 = vpop.permute.xlu0 %1016 }
 0x916   :  { %v1022_v13 = vsel %vm254_vm3, %v1017_v12, 0 }
 0x91c   :  { %v2394_v63 = vpop.eup %2393 }
 0x91d   :  { %v783_v0 = vsel %vm301_vm4, %v2394_v63, 0.0 }
 0x91e   :  { %784 = vadd.xlane.f32.xlu1 %v783_v0 }
 0x92f   :  { %905 = vrot.lane.b32.xlu1 %v2839_v55, %s2563_s25 }
 0x933   :  { %1014 = vrot.lane.b32.xlu1 %v2839_v55, %s2562_s2 }
 0x94c   :  { %v720_v21 = vpop.f32.mrb[16].mxu0 }
 0x94d   :  { %v2851_v2 = vadd.f32 %v720_v21, %v2808_v18  ;;  %v2188_v3 = vpop.f32.mrb[17].mxu0 }
 0x94e   :  { %v723_v4 = vpop.f32.mrb[18].mxu0 }
 0x94f   :  { %v2189_v5 = vpop.f32.mrb[19].mxu0 }
 0x9ab   :  { %v785_v6 = vpop.xlane.xlu1 %784 }
 0x9ac   :  { %2395 = vrcp.f32 %v785_v6 }
 0x9af   :  { %v906_v9 = vpop.permute.xlu1 %905 }
 0x9b0   :  { %v911_v11 = vsel %vm254_vm3, %v906_v9, 0 }
 0x9b3   :  { %v1015_v14 = vpop.permute.xlu1 %1014 }
 0x9b6   :  { %v2396_v7 = vpop.eup %2395 }
 0x9b7   :  { %v787_v8 = vmul.f32 %v2396_v7, %v2394_v63 }
 0x9b9   :  { %v788_v10 = vpack.c.bf16 %v787_v8, %v787_v8 }
 0x9bb   :  { %2199 = vmatmul.mubr.msk.bf16.vlgmr.msra.gmra.mrb[20].mxu0 %vm316_vm6, %v788_v10 }
 0x9bc   :  { %2209 = vmatpush3.bf16.xpose.msra.mxu0 %v911_v11  ;;  %2210 = vmatprep.mubr.msk.bf16.mxu0 %vm2561_vm0, %v2560_v1 }
 0x9bd   :  { %2220 = vmatprep.subr.bf16.mxu0 %v2560_v1 }
 0x9c3   :  { %2211 = vmatmul.mubr.msk.bf16.vlgmr.msra.gmra.mrb[24].mxu0 %vm254_vm3, %v2839_v55 }
 0x9c4   :  { %2221 = vmatpush3.bf16.xpose.msra.mxu0 %v1022_v13  ;;  %2222 = vmatprep.mubr.msk.bf16.mxu0 %vm2561_vm0, %v2560_v1 }
 0x9c5   :  { %2232 = vmatprep.subr.bf16.mxu0 %v2560_v1 }
 0x9cb   :  { %2223 = vmatmul.mubr.msk.bf16.vlgmr.msra.gmra.mrb[28].mxu0 %vm254_vm3, %v1015_v14 }
 0x9cc   :  { %2233 = vmatpush3.bf16.msra.mxu0 %v2792_v62  ;;  %2234 = vmatprep.mubr.msk.bf16.mxu0 %vm2561_vm0, %v2560_v1 }
 0x9cd   :  { %2244 = vmatprep.subr.bf16.mxu0 %v2560_v1 }
 0xa8e   :  { %v831_v17 = vpop.f32.mrb[20].mxu0 }
 0xa8f   :  { %v837_v18 = vpack.c.bf16 %v831_v17, %v831_v17  ;;  %v2200_v19 = vpop.f32.mrb[21].mxu0 }
 0xa90   :  { %v834_v20 = vpop.f32.mrb[22].mxu0 }
 0xa91   :  { %v2201_v22 = vpop.f32.mrb[23].mxu0  ;;  %2205 = vmatmul.mubr.msk.bf16.vlgmr.msra.gmra.mrb[28].mxu1 %vm254_vm3, %v837_v18 }
 0xa92   :  { %2216 = vmatprep.mubr.msk.bf16.mxu1 %vm2561_vm0, %v2560_v1 }
 0xa96   :  { %v947_v62 = vpop.f32.mrb[24].mxu0 }
 0xa97   :  { %v2212_v23 = vpop.f32.mrb[25].mxu0  ;;  %v953_v24 = vsel %vm301_vm4, %v947_v62, -inf }
 0xa98   :  { %954 = vmax.xlane.f32.xlu0 %v953_v24  ;;  %v950_v25 = vpop.f32.mrb[26].mxu0 }
 0xa99   :  { %v2213_v26 = vpop.f32.mrb[27].mxu0 }
 0xa9e   :  { %v1058_v27 = vpop.f32.mrb[28].mxu0 }
 0xa9f   :  { %v2224_v28 = vpop.f32.mrb[29].mxu0  ;;  %v1064_v29 = vsel %vm301_vm4, %v1058_v27, -inf }
 0xaa0   :  { %1065 = vmax.xlane.f32.xlu1 %v1064_v29  ;;  %v1061_v30 = vpop.f32.mrb[30].mxu0 }
 0xaa1   :  { %v2225_v31 = vpop.f32.mrb[31].mxu0 }
 0xab1   :  { %965 = vrot.lane.b32.xlu1 %v2839_v55, %s2556_s10 }
 0xab5   :  { %1213 = vrot.lane.b32.xlu1 %v2839_v55, %s2567_s27 }
 0xab9   :  { %1211 = vrot.lane.b32.xlu1 %v2839_v55, %s2566_s30 }
 0xb25   :  { %v955_v32 = vpop.xlane.xlu0 %954 }
 0xb26   :  { %v956_v33 = vsub.f32 %v947_v62, %v955_v32 }
 0xb28   :  { %v957_v34 = vmul.f32 1.442695, %v956_v33 }
 0xb2a   :  { %2397 = vpow2.f32 %v957_v34 }
 0xb2d   :  { %v1066_v35 = vpop.xlane.xlu1 %1065 }
 0xb2e   :  { %v1067_v36 = vsub.f32 %v1058_v27, %v1066_v35 }
 0xb30   :  { %v1068_v37 = vmul.f32 1.442695, %v1067_v36 }
 0xb31   :  { %v966_v38 = vpop.permute.xlu1 %965 }
 0xb32   :  { %2399 = vpow2.f32 %v1068_v37  ;;  %v971_v39 = vsel %vm320_vm5, %v966_v38, 0 }
 0xb33   :  { %2215 = vmatpush3.bf16.msra.mxu1 %v971_v39 }
 0xb34   :  { %v2398_v40 = vpop.eup %2397  ;;  %2226 = vmatprep.subr.bf16.mxu1 %v2560_v1 }
 0xb35   :  { %v959_v41 = vsel %vm301_vm4, %v2398_v40, 0.0  ;;  %v1214_v6 = vpop.permute.xlu1 %1213 }
 0xb36   :  { %960 = vadd.xlane.f32.xlu0 %v959_v41  ;;  %v1219_v10 = vsel %vm254_vm3, %v1214_v6, 0 }
 0xb39   :  { %v1212_v12 = vpop.permute.xlu1 %1211 }
 0xb3c   :  { %v2400_v42 = vpop.eup %2399 }
 0xb3d   :  { %v1070_v44 = vsel %vm301_vm4, %v2400_v42, 0.0 }
 0xb3e   :  { %1071 = vadd.xlane.f32.xlu0 %v1070_v44 }
 0xb54   :  { %1076 = vrot.lane.b32.xlu0 %v2839_v55, %s2565_s4 }
 0xb64   :  { %v878_v45 = vpop.f32.mrb[28].mxu1 }
 0xb65   :  { %v884_v47 = vadd.f32 %v878_v45, %v2851_v2  ;;  %v2206_v48 = vpop.f32.mrb[29].mxu1 }
 0xb66   :  { %v881_v49 = vpop.f32.mrb[30].mxu1 }
 0xb67   :  { %v892_v50 = vadd.f32 %v2891_v46, %v884_v47  ;;  %v2207_v51 = vpop.f32.mrb[31].mxu1 }
 0xb69   :  { %894 = vst.msk [vmem:[#allocation3] sm:$0x1] %vm893_vm8, %v892_v50 }
 0xb6a   :  { %896 = vst.msk [vmem:[#allocation3 + $0x1] sm:$0x2] %vm895_vm9, %v892_v50 }
 0xb6b   :  { %898 = vst.msk [vmem:[#allocation3 + $0x2] sm:$0x4] %vm897_vm10, %v892_v50 }
 0xb6c   :  { %900 = vst.msk [vmem:[#allocation3 + $0x3] sm:$0x8] %vm899_vm11, %v892_v50 }
 0xbc3   :  { %v961_v52 = vpop.xlane.xlu0 %960 }
 0xbc4   :  { %2401 = vrcp.f32 %v961_v52 }
 0xbcb   :  { %v1072_v53 = vpop.xlane.xlu0 %1071 }
 0xbcc   :  { %2403 = vrcp.f32 %v1072_v53 }
 0xbce   :  { %v2402_v54 = vpop.eup %2401 }
 0xbcf   :  { %v963_v56 = vmul.f32 %v2402_v54, %v2398_v40  ;;  %v1077_v57 = vpop.permute.xlu0 %1076 }
 0xbd0   :  { %v1082_v59 = vsel %vm320_vm5, %v1077_v57, 0 }
 0xbd1   :  { %v964_v58 = vpack.c.bf16 %v963_v56, %v963_v56 }
 0xbd3   :  { %2217 = vmatmul.mubr.msk.bf16.vlgmr.msra.gmra.mrb[32].mxu1 %vm316_vm6, %v964_v58 }
 0xbd4   :  { %2227 = vmatpush3.bf16.msra.mxu1 %v1082_v59  ;;  %2228 = vmatprep.mubr.msk.bf16.mxu1 %vm2561_vm0, %v2560_v1 }
 0xbd5   :  { %2238 = vmatprep.subr.bf16.mxu1 %v2560_v1 }
 0xbd6   :  { %v2404_v61 = vpop.eup %2403 }
 0xbd7   :  { %v1074_v63 = vmul.f32 %v2404_v61, %v2400_v42 }
 0xbd9   :  { %v1075_v0 = vpack.c.bf16 %v1074_v63, %v1074_v63 }
 0xbdb   :  { %2229 = vmatmul.mubr.msk.bf16.vlgmr.msra.gmra.mrb[36].mxu1 %vm316_vm6, %v1075_v0 }
 0xbdc   :  { %2239 = vmatpush3.bf16.msra.mxu1 %v2788_v60  ;;  %2240 = vmatprep.mubr.msk.bf16.mxu1 %vm2561_vm0, %v2560_v1 }
 0xbdd   :  { %2250 = vmatprep.subr.bf16.mxu1 %v2560_v1 }
 0xca6   :  { %v1007_v21 = vpop.f32.mrb[32].mxu1 }
 0xca7   :  { %v1013_v2 = vpack.c.bf16 %v1007_v21, %v1007_v21  ;;  %v2218_v3 = vpop.f32.mrb[33].mxu1 }
 0xca8   :  { %v1010_v4 = vpop.f32.mrb[34].mxu1 }
 0xca9   :  { %v2219_v5 = vpop.f32.mrb[35].mxu1  ;;  %2241 = vmatmul.mubr.msk.bf16.vlgmr.msra.gmra.mrb[40].mxu1 %vm254_vm3, %v1013_v2 }
 0xcaa   :  { %2252 = vmatprep.mubr.msk.bf16.mxu1 %vm2561_vm0, %v2560_v1 }
 0xcae   :  { %v1118_v7 = vpop.f32.mrb[36].mxu1 }
 0xcaf   :  { %v1124_v8 = vpack.c.bf16 %v1118_v7, %v1118_v7  ;;  %v2230_v9 = vpop.f32.mrb[37].mxu1  ;;  %v2365_v7 = vld [vmem:[%s3056_s7] sm:$0xff]  }
 0xcb0   :  { %v1121_v60 = vpop.f32.mrb[38].mxu1 }
 0xcb1   :  { %v2231_v11 = vpop.f32.mrb[39].mxu1  ;;  %2235 = vmatmul.mubr.msk.bf16.vlgmr.msra.gmra.mrb[32].mxu0 %vm254_vm3, %v1124_v8 }
 0xcb2   :  { %2245 = vmatpush3.bf16.xpose.msra.mxu0 %v1219_v10  ;;  %2246 = vmatprep.mubr.msk.bf16.mxu0 %vm2561_vm0, %v2560_v1  ;;  %v2366_v11 = vld [vmem:[%s3056_s7 + $0x8] sm:$0xff]  }
 0xcb3   :  { %2256 = vmatprep.subr.bf16.mxu0 %v2560_v1 }
 0xcb9   :  { %2247 = vmatmul.mubr.msk.bf16.vlgmr.msra.gmra.mrb[36].mxu0 %vm254_vm3, %v1212_v12  ;;  %v1533_v12 = vld [vmem:[#allocation3] ss:$4 sm:$0x3] }
 0xcba   :  { %2257 = vmatpush3.bf16.msra.mxu0 %v2829_v43  ;;  %2258 = vmatprep.mubr.msk.bf16.mxu0 %vm2561_vm0, %v2560_v1 }
 0xcbb   :  { %2268 = vmatprep.subr.bf16.mxu0 %v2560_v1 }
 0xd7c   :  { %v1205_v13 = vpop.f32.mrb[40].mxu1 }
 0xd7d   :  { %v2242_v14 = vpop.f32.mrb[41].mxu1 }
 0xd7e   :  { %v1208_v15 = vpop.f32.mrb[42].mxu1  ;;  %v2367_v14 = vld [vmem:[%s3056_s7 + $0x10] sm:$0xff]  }
 0xd7f   :  { %v2243_v17 = vpop.f32.mrb[43].mxu1  ;;  %v2368_v15 = vld [vmem:[%s3056_s7 + $0x30] sm:$0xff]  }
 0xd80   :  { %v2369_v17 = vld [vmem:[%s3056_s7 + $0x18] sm:$0xff]  }
 0xd84   :  { %v1162_v18 = vpop.f32.mrb[32].mxu0 }
 0xd85   :  { %v1206_v19 = vadd.f32 %v1205_v13, %v1162_v18  ;;  %v2236_v20 = vpop.f32.mrb[33].mxu0  ;;  %v1534_v13 = vpack.c.bf16 %v1533_v12, %v1533_v12  ;;  %v2370_v18 = vld [vmem:[%s3056_s7 + $0x38] sm:$0xff]   ;;  %v1908_v12 = vld [vmem:[#allocation13] sm:$0x1] }
 0xd86   :  { %v1165_v22 = vpop.f32.mrb[34].mxu0 }
 0xd87   :  { %v2237_v62 = vpop.f32.mrb[35].mxu0 }
 0xd8c   :  { %v1255_v23 = vpop.f32.mrb[36].mxu0 }
 0xd8d   :  { %v2248_v24 = vpop.f32.mrb[37].mxu0  ;;  %v1261_v25 = vsel %vm301_vm4, %v1255_v23, -inf }
 0xd8e   :  { %1262 = vmax.xlane.f32.xlu0 %v1261_v25  ;;  %v1258_v43 = vpop.f32.mrb[38].mxu0 }
 0xd8f   :  { %v2249_v26 = vpop.f32.mrb[39].mxu0 }
 0xda4   :  { %1273 = vrot.lane.b32.xlu0 %v2839_v55, %s2570_s16 }
 0xda8   :  { %1366 = vrot.lane.b32.xlu0 %v2839_v55, %s2569_s14 }
 0xe1b   :  { %v1263_v27 = vpop.xlane.xlu0 %1262 }
 0xe1c   :  { %v1264_v28 = vsub.f32 %v1255_v23, %v1263_v27 }
 0xe1e   :  { %v1265_v29 = vmul.f32 1.442695, %v1264_v28  ;;  %v2371_v28 = vld [vmem:[%s3056_s7 + $0x20] sm:$0xff]  }
 0xe1f   :  { %v1274_v30 = vpop.permute.xlu0 %1273 }
 0xe20   :  { %2405 = vpow2.f32 %v1265_v29  ;;  %v1279_v31 = vsel %vm320_vm5, %v1274_v30, 0 }
 0xe21   :  { %2251 = vmatpush3.bf16.msra.mxu1 %v1279_v31 }
 0xe22   :  { %2262 = vmatprep.subr.bf16.mxu1 %v2560_v1 }
 0xe23   :  { %v1367_v40 = vpop.permute.xlu0 %1366 }
 0xe2a   :  { %v2406_v32 = vpop.eup %2405 }
 0xe2b   :  { %v1267_v33 = vsel %vm301_vm4, %v2406_v32, 0.0 }
 0xe2c   :  { %1268 = vadd.xlane.f32.xlu1 %v1267_v33  ;;  %v1657_v33 = vld [vmem:[#allocation3 + $0x2] ss:$4 sm:$0x3] }
 0xe3d   :  { %1368 = vrot.lane.b32.xlu1 %v2839_v55, %s2568_s29 }
 0xeb9   :  { %v1269_v34 = vpop.xlane.xlu1 %1268 }
 0xeba   :  { %2407 = vrcp.f32 %v1269_v34  ;;  %v2373_v34 = vld [vmem:[%s3058_s9] sm:$0xff]  }
 0xebd   :  { %v1369_v37 = vpop.permute.xlu1 %1368 }
 0xebe   :  { %v1374_v39 = vsel %vm254_vm3, %v1369_v37, 0  ;;  %v2375_v37 = vld [vmem:[%s3058_s9 + $0x10] sm:$0xff]  }
 0xec4   :  { %v2408_v35 = vpop.eup %2407 }
 0xec5   :  { %v1271_v36 = vmul.f32 %v2408_v35, %v2406_v32  ;;  %v2372_v32 = vld [vmem:[%s3056_s7 + $0x28] sm:$0xff]   ;;  %v1658_v35 = vpack.c.bf16 %v1657_v33, %v1657_v33 }
 0xec7   :  { %v1272_v38 = vpack.c.bf16 %v1271_v36, %v1271_v36  ;;  %v2374_v36 = vld [vmem:[%s3058_s9 + $0x8] sm:$0xff]  }
 0xec9   :  { %2253 = vmatmul.mubr.msk.bf16.vlgmr.msra.gmra.mrb[44].mxu1 %vm316_vm6, %v1272_v38  ;;  %v2376_v38 = vld [vmem:[%s3058_s9 + $0x18] sm:$0xff]  }
 0xeca   :  { %2263 = vmatpush3.bf16.xpose.msra.mxu1 %v1374_v39  ;;  %2264 = vmatprep.mubr.msk.bf16.mxu1 %vm2561_vm0, %v2560_v1  ;;  %v2377_v39 = vld [vmem:[%s3058_s9 + $0x20] sm:$0xff]  }
 0xecb   :  { %2274 = vmatprep.subr.bf16.mxu1 %v2560_v1 }
 0xed1   :  { %2265 = vmatmul.mubr.msk.bf16.vlgmr.msra.gmra.mrb[48].mxu1 %vm254_vm3, %v1367_v40  ;;  %v2378_v40 = vld [vmem:[%s3058_s9 + $0x28] sm:$0xff]  }
 0xed2   :  { %2275 = vmatpush3.bf16.msra.mxu1 %v2870_v16  ;;  %2276 = vmatprep.mubr.msk.bf16.mxu1 %vm2561_vm0, %v2560_v1 }
 0xed3   :  { %2288 = vmatprep.subr.bf16.mxu1 %v2560_v1 }
 0xf9c   :  { %v1315_v41 = vpop.f32.mrb[44].mxu1 }
 0xf9d   :  { %v1321_v42 = vpack.c.bf16 %v1315_v41, %v1315_v41  ;;  %v2254_v44 = vpop.f32.mrb[45].mxu1  ;;  %v2379_v41 = vld [vmem:[%s3058_s9 + $0x30] sm:$0xff]  }
 0xf9e   :  { %v1318_v45 = vpop.f32.mrb[46].mxu1 }
 0xf9f   :  { %v2255_v47 = vpop.f32.mrb[47].mxu1  ;;  %2259 = vmatmul.mubr.msk.bf16.vlgmr.msra.gmra.mrb[40].mxu0 %vm254_vm3, %v1321_v42  ;;  %v2380_v42 = vld [vmem:[%s3058_s9 + $0x38] sm:$0xff]   ;;  %s2573_s9 = smov [#allocation14]  }
 0xfa0   :  { %2270 = vmatprep.mubr.msk.bf16.mxu0 %vm2561_vm0, %v2560_v1  ;;  %s1975_s15 = sshll.u32 %s2573_s9, 4  ;;  %s1976_s15 = int_to_ptr.vmem [resolvable:$true] %s1975_s15 }
 0xfa1   :  { %s2523_s18 = scalar_lea.vmem %s1976_s15, 16  ;;  %s2527_s11 = scalar_lea.vmem %s1976_s15, 32 }
 0xfa2   :  { %p2524_p12 = scmp.ne.s32.totalorder %s1976_s15, %s2523_s18  ;;  %p2528_p13 = scmp.lt.s32.totalorder %s1976_s15, %s1976_s15 }
 0xfa3   :  { %p2529_p0 = scmp.lt.s32.totalorder %s2527_s11, %s2523_s18 }
 0xfa4   :  { %v1410_v48 = vpop.f32.mrb[48].mxu1 }
 0xfa5   :  { %v2266_v49 = vpop.f32.mrb[49].mxu1  ;;  %v1416_v50 = vsel %vm301_vm4, %v1410_v48, -inf  ;;  %p2530_p1 = por %p2529_p0, %p2528_p13 }
 0xfa6   :  { %1417 = vmax.xlane.f32.xlu1 %v1416_v50  ;;  %v1413_v16 = vpop.f32.mrb[50].mxu1 }
 0xfa7   :  { %v2267_v51 = vpop.f32.mrb[51].mxu1  ;;  %p2531_p2 = pnand %p2530_p1, %p2524_p12 }
0x1033   :  { %v1418_v52 = vpop.xlane.xlu1 %1417 }
0x1034   :  { %v1419_v53 = vsub.f32 %v1410_v48, %v1418_v52 }
0x1036   :  { %v1420_v54 = vmul.f32 1.442695, %v1419_v53 }
0x1038   :  { %2409 = vpow2.f32 %v1420_v54 }
0x1042   :  { %v2410_v56 = vpop.eup %2409 }
0x1043   :  { %v1422_v57 = vsel %vm301_vm4, %v2410_v56, 0.0 }
0x1044   :  { %1423 = vadd.xlane.f32.xlu0 %v1422_v57  ;;  %v2032_v57 = vld [vmem:[#allocation10] ss:$0 sm:$0xff] }
0x105a   :  { %1428 = vrot.lane.b32.xlu0 %v2839_v55, %s2571_s6 }
0x1072   :  { %v1359_v58 = vpop.f32.mrb[40].mxu0 }
0x1073   :  { %v1365_v59 = vadd.f32 %v1359_v58, %v1206_v19  ;;  %v2260_v61 = vpop.f32.mrb[41].mxu0 }
0x1074   :  { %v1362_v63 = vpop.f32.mrb[42].mxu0 }
0x1075   :  { %v2261_v0 = vpop.f32.mrb[43].mxu0 }
0x10d1   :  { %v1424_v21 = vpop.xlane.xlu0 %1423 }
0x10d2   :  { %2411 = vrcp.f32 %v1424_v21 }
0x10d5   :  { %v1429_v2 = vpop.permute.xlu0 %1428 }
0x10d6   :  { %v1434_v3 = vsel %vm320_vm5, %v1429_v2, 0  ;;  %v1910_v2 = vld [vmem:[#allocation4] sm:$0x1] }
0x10d7   :  { %2269 = vmatpush3.bf16.msra.mxu0 %v1434_v3  ;;  %v2572_v3 = vmov 0  }
0x10d8   :  { %2280 = vmatprep.subr.bf16.mxu0 %v2560_v1  ;;  %2359 = vset.pattern.permute.xlu1 %v2572_v3 }
0x10d9   :  { %2360 = vset.pattern.permute.xlu0 %v2572_v3  ;;  %1913 = vperm.xlu1 %2359, %v1910_v2  }
0x10dc   :  { %v2412_v4 = vpop.eup %2411 }
0x10dd   :  { %v1426_v5 = vmul.f32 %v2412_v4, %v2410_v56  ;;  %v2033_v4 = vld [vmem:[#allocation11] ss:$0 sm:$0xff] }
0x10df   :  { %v1427_v6 = vpack.c.bf16 %v1426_v5, %v1426_v5 }
0x10e1   :  { %2271 = vmatmul.mubr.msk.bf16.vlgmr.msra.gmra.mrb[44].mxu0 %vm316_vm6, %v1427_v6 }
0x10e2   :  { %2284 = vmatprep.mubr.msk.bf16.mxu0 %vm2561_vm0, %v2560_v1  ;;  %2281 = vmatpush3.bf16.msra.mxu0 %v2367_v14 }
0x10e3   :  { %2282 = vmatprep.subr.bf16.mxu0 %v2560_v1 }
0x10e6   :  { %2283 = vmatpush3.bf16.msra.mxu0 %v2369_v17 }
0x10e7   :  { %2296 = vmatprep.subr.bf16.mxu0 %v2560_v1 }
0x1158   :  { %v1914_v17 = vpop.permute.xlu1 %1913 }
0x11b4   :  { %v1470_v55 = vpop.f32.mrb[44].mxu0 }
0x11b5   :  { %v1476_v8 = vpack.c.bf16 %v1470_v55, %v1470_v55  ;;  %v2272_v9 = vpop.f32.mrb[45].mxu0 }
0x11b6   :  { %v1473_v60 = vpop.f32.mrb[46].mxu0 }
0x11b7   :  { %v2273_v10 = vpop.f32.mrb[47].mxu0  ;;  %2277 = vmatmul.mubr.msk.bf16.vlgmr.msra.gmra.mrb[52].mxu1 %vm254_vm3, %v1476_v8 }
0x11b8   :  { %2289 = vmatpush3.bf16.msra.mxu1 %v2365_v7  ;;  %2292 = vmatprep.mubr.msk.bf16.mxu1 %vm2561_vm0, %v2560_v1 }
0x11b9   :  { %2290 = vmatprep.subr.bf16.mxu1 %v2560_v1 }
0x11bc   :  { %2291 = vmatpush3.bf16.msra.mxu1 %v2366_v11 }
0x11bd   :  { %2304 = vmatprep.subr.bf16.mxu1 %v2560_v1 }
0x11bf   :  { %2293 = vmatmul.mubr.msk.bf16.vlgmr.msra.gmra.mrb[56].mxu1 %vm132_vm1, %v1534_v13  ;;  %v1916_v13 = vlaneseq }
0x11c0   :  { %2308 = vmatprep.mubr.msk.bf16.mxu1 %vm2561_vm0, %v2560_v1  ;;  %2305 = vmatpush3.bf16.msra.mxu1 %v2368_v15 }
0x11c1   :  { %2306 = vmatprep.subr.bf16.mxu1 %v2560_v1  ;;  %v1917_v14 = vshrl.u32 %v1916_v13, 7 }
0x11c3   :  { %v1918_v15 = vsub.s32 0, %v1917_v14 }
0x11c4   :  { %2307 = vmatpush3.bf16.msra.mxu1 %v2370_v18 }
0x11c5   :  { %2332 = vmatprep.subr.bf16.mxu1 %v2560_v1  ;;  %v1919_v18 = vrot.slane %v1914_v17, %v1918_v15 }
0x128a   :  { %v1514_v19 = vpop.f32.mrb[52].mxu1 }
0x128b   :  { %v1520_v20 = vadd.f32 %v1514_v19, %v1365_v59  ;;  %v2278_v22 = vpop.f32.mrb[53].mxu1 }
0x128c   :  { %v1517_v62 = vpop.f32.mrb[54].mxu1 }
0x128d   :  { %v1528_v23 = vadd.f32 %v2891_v46, %v1520_v20  ;;  %v2279_v24 = vpop.f32.mrb[55].mxu1 }
0x128f   :  { %1529 = vst.msk [vmem:[#allocation3 + $0x1] sm:$0x1] %vm893_vm8, %v1528_v23 }
0x1290   :  { %1530 = vst.msk [vmem:[#allocation3 + $0x2] sm:$0x2] %vm895_vm9, %v1528_v23 }
0x1291   :  { %1531 = vst.msk [vmem:[#allocation3 + $0x3] sm:$0x4] %vm897_vm10, %v1528_v23 }
0x1292   :  { %1532 = vst.msk [vmem:[#allocation3 + $0x4] sm:$0x8] %vm899_vm11, %v1528_v23  ;;  %v1650_v25 = vpop.f32.mrb[56].mxu1 }
0x1293   :  { %v2294_v43 = vpop.f32.mrb[57].mxu1 }
0x1294   :  { %v1653_v26 = vpop.f32.mrb[58].mxu1 }
0x1295   :  { %v2295_v27 = vpop.f32.mrb[59].mxu1 }
0x1298   :  { %v1540_v29 = vld [vmem:[#allocation3 + $0x1] ss:$4 sm:$0x3] }
0x1299   :  { %v1720_v30 = vld [vmem:[#allocation3 + $0x3] ss:$4 sm:$0x3]  ;;  %v1541_v46 = vpack.c.bf16 %v1540_v29, %v1540_v29 }
0x129a   :  { %v1721_v31 = vpack.c.bf16 %v1720_v30, %v1720_v30 }
0x129b   :  { %2285 = vmatmul.mubr.msk.bf16.vlgmr.msra.gmra.mrb[48].mxu0 %vm132_vm1, %v1541_v46 }
0x129c   :  { %2309 = vmatmul.mubr.msk.bf16.vlgmr.msra.gmra.mrb[60].mxu1 %vm132_vm1, %v1721_v31  ;;  %2297 = vmatpush3.bf16.msra.mxu0 %v2371_v28 }
0x129d   :  { %2300 = vmatprep.mubr.msk.bf16.mxu0 %vm2561_vm0, %v2560_v1  ;;  %2298 = vmatprep.subr.bf16.mxu0 %v2560_v1 }
0x129e   :  { %2334 = vmatprep.mubr.msk.bf16.mxu1 %vm2561_vm0, %v2560_v1 }
0x12a0   :  { %2299 = vmatpush3.bf16.msra.mxu0 %v2372_v32 }
0x12a1   :  { %2312 = vmatprep.subr.bf16.mxu0 %v2560_v1 }
0x12a3   :  { %2301 = vmatmul.mubr.msk.bf16.vlgmr.msra.gmra.mrb[52].mxu0 %vm132_vm1, %v1658_v35 }
0x12a4   :  { %2313 = vmatpush3.bf16.msra.mxu0 %v2373_v34  ;;  %2328 = vmatprep.mubr.msk.bf16.mxu0 %vm2561_vm0, %v2560_v1 }
0x12a5   :  { %2314 = vmatprep.subr.bf16.mxu0 %v2560_v1 }
0x12a8   :  { %2315 = vmatpush3.bf16.msra.mxu0 %v2374_v36 }
0x12a9   :  { %2316 = vmatprep.subr.bf16.mxu0 %v2560_v1 }
0x12ac   :  { %2317 = vmatpush3.bf16.msra.mxu0 %v2375_v37 }
0x12ad   :  { %2318 = vmatprep.subr.bf16.mxu0 %v2560_v1 }
0x12b0   :  { %2319 = vmatpush3.bf16.msra.mxu0 %v2376_v38 }
0x12b1   :  { %2320 = vmatprep.subr.bf16.mxu0 %v2560_v1 }
0x12b4   :  { %2321 = vmatpush3.bf16.msra.mxu0 %v2377_v39 }
0x12b5   :  { %2322 = vmatprep.subr.bf16.mxu0 %v2560_v1 }
0x12b8   :  { %2323 = vmatpush3.bf16.msra.mxu0 %v2378_v40 }
0x12b9   :  { %2324 = vmatprep.subr.bf16.mxu0 %v2560_v1 }
0x12bc   :  { %2325 = vmatpush3.bf16.msra.mxu0 %v2379_v41 }
0x12bd   :  { %2326 = vmatprep.subr.bf16.mxu0 %v2560_v1 }
0x12c0   :  { %2327 = vmatpush3.bf16.msra.mxu0 %v2380_v42 }
0x136e   :  { %v1595_v44 = vpop.f32.mrb[48].mxu0 }
0x136f   :  { %v1775_v45 = vpop.f32.mrb[60].mxu1  ;;  %v1651_v47 = vadd.f32 %v1650_v25, %v1595_v44  ;;  %v2286_v48 = vpop.f32.mrb[49].mxu0 }
0x1370   :  { %v2310_v49 = vpop.f32.mrb[61].mxu1  ;;  %v1598_v50 = vpop.f32.mrb[50].mxu0 }
0x1371   :  { %v1778_v16 = vpop.f32.mrb[62].mxu1  ;;  %v2287_v51 = vpop.f32.mrb[51].mxu0 }
0x1372   :  { %v2311_v52 = vpop.f32.mrb[63].mxu1 }
0x1376   :  { %v1712_v53 = vpop.f32.mrb[52].mxu0 }
0x1377   :  { %v1718_v54 = vadd.f32 %v1712_v53, %v1651_v47  ;;  %v2302_v56 = vpop.f32.mrb[53].mxu0 }
0x1378   :  { %v1715_v58 = vpop.f32.mrb[54].mxu0 }
0x1379   :  { %v1781_v1 = vadd.f32 %v1775_v45, %v1718_v54  ;;  %v2303_v59 = vpop.f32.mrb[55].mxu0 }
0x137b   :  { %v1789_v61 = vadd.f32 %v2032_v57, %v1781_v1 }
0x137d   :  { %vm1790_vm12 = vcmp.ge.f32.partialorder %v1789_v61, 0.0  ;;  %v1791_v63 = vmul.f32 0.2, %v1789_v61 }
0x137f   :  { %v1792_v0 = vsel %vm1790_vm12, %v1789_v61, %v1791_v63 }
0x1380   :  { %v1793_v21 = vpack.c.bf16 %v1792_v0, %v1792_v0 }
0x1382   :  { %2329 = vmatmul.mubr.bf16.vlgmr.msra.gmra.mrb[56].mxu0 %v1793_v21 }
0x1455   :  { %v1899_v5 = vpop.f32.mrb[56].mxu0 }
0x1456   :  { %v1900_v6 = vadd.f32 %v2033_v4, %v1899_v5  ;;  %v2330_v55 = vpop.f32.mrb[57].mxu0 }
0x1457   :  { %v1902_v7 = vpop.f32.mrb[58].mxu0 }
0x1458   :  { %vm1905_vm13 = vcmp.ge.f32.partialorder %v1900_v6, 0.0  ;;  %v1906_v8 = vmul.f32 0.2, %v1900_v6  ;;  %v2331_v9 = vpop.f32.mrb[59].mxu0 }
0x145a   :  { %v1907_v60 = vsel %vm1905_vm13, %v1900_v6, %v1906_v8 }
0x145b   :  { %v1909_v10 = vpack.c.bf16 %v1907_v60, %v1907_v60 }
0x145d   :  { %v1925_v11 = vsel %vm1920_vm14, %v1909_v10, 0 }
0x145e   :  { %2333 = vmatpush3.bf16.xpose.msra.mxu1 %v1925_v11 }
0x1465   :  { %2335 = vmatmul.mubr.msk.bf16.vlgmr.msra.gmra.mrb[64].mxu1 %vm1920_vm14, %v1908_v12 }
0x1538   :  { %v1961_v19 = vpop.f32.mrb[64].mxu1 }
0x1539   :  { %v1962_v20 = vadd.f32 %v1961_v19, %v1919_v18  ;;  %v2336_v22 = vpop.f32.mrb[65].mxu1 }
0x153a   :  { %v1964_v62 = vpop.f32.mrb[66].mxu1 }
0x153b   :  { %v2337_v23 = vpop.f32.mrb[67].mxu1  ;;  %1968 = vst.msk [vmem:[#allocation14] sm:$0x1] %vm1967_vm15, %v1962_v20 }
0x153c   :  { %2534 = shalt.err (!%p2531_p2)
}
0x153d   :  { %s2535_s20 = scalar_lea.hbm %s3062_s13, 16 }
0x153e   :  { %p2536_p3 = scmp.ne.s32.totalorder %s3062_s13, %s2535_s20  ;;  %p2539_p4 = scmp.lt.u32.totalorder %s2535_s20, %s3062_s13 }
0x1540   :  { %p2541_p5 = pnand %p2539_p4, %p2536_p3 }
0x1542   :  { %2544 = shalt.err (!%p2541_p5)
}
0x1543   :  { %1978 = dma.vmem_to_hbm [thread:$0]  %s1976_s15, 16, %s3062_s13, [#allocation7]  }
0x1544   :  { %2551 = dma.done.wait [#allocation7], 16  }
0x1545   :  { %2552 = vsyncadd [#allocation7], 4294967280 }
0x1546   :  { %1982 = vsyncpa [#allocation6], 1 }
0x1547   :  { %1983 = vsyncpa [#allocation9], 1 }
0x1548   :  { %1984 = vsyncpa [#allocation12], 1 }
0x1549   :  { %1985 = vsyncpa [#allocation7], 1 }

</bundles_post_ra>
